<compile_context>
chip_gen: v7x
topology: tpu7x:2x2x1
jax: 0.10.0
libtpu: 0.0.40
codegen_flags: <defaults>
</compile_context>

<pallas_src>
import math

import jax
import jax.numpy as jnp
from jax import lax
from jax.experimental import pallas as pl
from jax.experimental.pallas import tpu as pltpu

# ----------------------------- "config" -------------------------------------
HIDDEN = 32          # config.hidden_size
NUM_HEADS = 4        # config.transformer['num_heads']
HEAD_DIM = HIDDEN // NUM_HEADS
IMG_SIZE = 16        # img_size
PATCH = 4            # config.patches['size'] = (4, 4)
N_PATCHES = (IMG_SIZE // PATCH) * (IMG_SIZE // PATCH)   # 16
SEQ = N_PATCHES + 1                                     # 17  (CLS + patches)
BATCH = 2


# ------------------------------ kernel --------------------------------------
def attention_kernel(x_ref, rel_ref, wqkv_ref, bqkv_ref, wo_ref, bo_ref,
                     out_ref, wts_ref):
    """Single invocation == the whole batch (everything VMEM-resident).

    x_ref    : (B*S, H)      VMEM (batch/token axes flattened in the wrapper)
    rel_ref  : (B*S, H)      VMEM (relative_pos_embedding, pre-tiled over batch)
    wqkv_ref : (H, 3H)       VMEM ([Wq | Wk | Wv], transposed: y = x @ W + b)
    bqkv_ref : (1, 3H)       VMEM ([bq | bk | bv])
    wo_ref   : (H, H)        VMEM
    bo_ref   : (1, H)        VMEM
    out_ref  : (B*S, H)      VMEM
    wts_ref  : (B, NH, S, S) VMEM (softmax probabilities, per head)
    """
    x = x_ref[...]                       # (B*S, H)
    scale = 1.0 / math.sqrt(HEAD_DIM)

    # Fused QKV projection: one (B*S, H) @ (H, 3H) MXU matmul, f32 accumulate.
    qkv = jnp.dot(x, wqkv_ref[...],
                  preferred_element_type=jnp.float32) + bqkv_ref[...]
    q = qkv[:, 0 * HIDDEN:1 * HIDDEN] * scale     # fold 1/sqrt(hd) into q once
    k = qkv[:, 1 * HIDDEN:2 * HIDDEN] + rel_ref[...]   # rel_pos added to key
    v = qkv[:, 2 * HIDDEN:3 * HIDDEN] + rel_ref[...]   # rel_pos added to value

    ctx_rows = []                                 # per-batch (S, H) contexts
    for b in range(BATCH):                        # static unroll over batch
        rows = slice(b * SEQ, (b + 1) * SEQ)
        qb = q[rows]                              # (S, H)
        kb = k[rows]                              # (S, H)
        vb = v[rows]                              # (S, H)

        ctx_heads = []
        probs_heads = []
        for h in range(NUM_HEADS):                # static unroll over heads
            cols = slice(h * HEAD_DIM, (h + 1) * HEAD_DIM)
            qh = qb[:, cols]                      # (S, hd)
            kh = kb[:, cols]                      # (S, hd)
            vh = vb[:, cols]                      # (S, hd)

            # Transpose-free scores: contract the head dim of qh and kh.
            scores = lax.dot_general(
                qh, kh, (((1,), (1,)), ((), ())),
                preferred_element_type=jnp.float32)          # (S, S)
            scores = scores - jnp.max(scores, axis=-1, keepdims=True)
            e = jnp.exp(scores)
            probs = e * pl.reciprocal(jnp.sum(e, axis=-1, keepdims=True),
                                      approx=False)
            probs_heads.append(probs)
            ctx_heads.append(jnp.dot(probs, vh,
                                     preferred_element_type=jnp.float32))

        # Batched attention-prob writeback: one (NH, S, S) store per batch.
        wts_ref[b] = jnp.stack(probs_heads, axis=0).astype(wts_ref.dtype)
        # Explicit head concat -> single output-projection matmul below.
        ctx_rows.append(jnp.concatenate(ctx_heads, axis=-1))  # (S, H)

    ctx_full = jnp.concatenate(ctx_rows, axis=0)               # (B*S, H)
    out = jnp.dot(ctx_full, wo_ref[...],
                  preferred_element_type=jnp.float32) + bo_ref[...]
    out_ref[...] = out.astype(out_ref.dtype)


# ------------------------------ wrapper --------------------------------------
def attention_forward(x, rel_pos, wq, bq, wk, bk, wv, bv, wo, bo):
    B, S, H = x.shape
    assert (B, S, H) == (BATCH, SEQ, HIDDEN)

    # One-time parameter plumbing (wrapper-side XLA ops on tiny arrays).
    wqkv = jnp.concatenate([wq, wk, wv], axis=1)        # (H, 3H)
    bqkv = jnp.concatenate([bq, bk, bv], axis=1)        # (1, 3H)
    x2 = x.reshape(B * S, H)                            # flatten batch/token
    rel2 = jnp.tile(rel_pos.reshape(S, H), (B, 1))      # (B*S, H)

    out2, wts = pl.pallas_call(
        attention_kernel,
        out_shape=(
            jax.ShapeDtypeStruct((B * S, H), jnp.float32),
            jax.ShapeDtypeStruct((B, NUM_HEADS, S, S), jnp.float32),
        ),
        # Whole arrays, VMEM-resident, no grid: no pipeline scaffolding.
        in_specs=[pl.BlockSpec(memory_space=pltpu.MemorySpace.VMEM)] * 6,
        out_specs=(
            pl.BlockSpec(memory_space=pltpu.MemorySpace.VMEM),
            pl.BlockSpec(memory_space=pltpu.MemorySpace.VMEM),
        ),
    )(x2, rel2, wqkv, bqkv, wo, bo)

    return out2.reshape(B, S, H), wts


# ----------------------- pure-JAX reference (for checking) -------------------
def attention_reference(x, rel_pos, wq, bq, wk, bk, wv, bv, wo, bo):
    B, S, H = x.shape
    q = x @ wq + bq
    k = x @ wk + bk + rel_pos
    v = x @ wv + bv + rel_pos

    def heads(t):  # (B,S,H) -> (B,NH,S,hd)
        return t.reshape(B, S, NUM_HEADS, HEAD_DIM).transpose(0, 2, 1, 3)

    qh, kh, vh = heads(q), heads(k), heads(v)
    scores = jnp.einsum('bhqd,bhkd->bhqk', qh, kh) / math.sqrt(HEAD_DIM)
    probs = jax.nn.softmax(scores, axis=-1)
    ctx = jnp.einsum('bhqk,bhkd->bhqd', probs, vh)
    ctx = ctx.transpose(0, 2, 1, 3).reshape(B, S, H)
    out = ctx @ wo + bo
    return out, probs


# --------------------------------- main ---------------------------------------
if __name__ == "__main__":
    key = jax.random.PRNGKey(0)
    ks = jax.random.split(key, 10)

    x = jax.random.normal(ks[0], (BATCH, SEQ, HIDDEN), jnp.float32)

    # Parameters (deterministic init; torch Linear weight (out,in) is stored
    # transposed here as (in,out)).  relative_pos_embedding is zeros in the
    # torch __init__; we use small random values to exercise the add path.
    def lin(k):
        wk_, bk_ = jax.random.split(k)
        w = jax.random.normal(wk_, (HIDDEN, HIDDEN), jnp.float32) * 0.05
        b = jax.random.normal(bk_, (1, HIDDEN), jnp.float32) * 0.05
        return w, b

    wq, bq = lin(ks[1])
    wk, bk = lin(ks[2])
    wv, bv = lin(ks[3])
    wo, bo = lin(ks[4])
    rel_pos = jax.random.normal(ks[5], (1, SEQ, HIDDEN), jnp.float32) * 0.02

    out, wts = attention_forward(x, rel_pos, wq, bq, wk, bk, wv, bv, wo, bo)
    out = jax.block_until_ready(out)
    wts = jax.block_until_ready(wts)

    ref_out, ref_wts = attention_reference(
        x, rel_pos, wq, bq, wk, bk, wv, bv, wo, bo)

    assert out.shape == (BATCH, SEQ, HIDDEN)
    assert wts.shape == (BATCH, NUM_HEADS, SEQ, SEQ)
    assert jnp.allclose(out, ref_out, atol=1e-4, rtol=1e-4)
    assert jnp.allclose(wts, ref_wts, atol=1e-5, rtol=1e-5)

    # TODO(synk): attn_dropout / proj_dropout are identity here (eval mode).
    print("KERNEL_OK")
</pallas_src>

<mosaic_0001>
module attributes {stable_mosaic.version = 11 : i64} {
  func.func @attention_kernel(%arg0: memref<34x32xf32, #tpu.memory_space<vmem>>, %arg1: memref<34x32xf32, #tpu.memory_space<vmem>>, %arg2: memref<32x96xf32, #tpu.memory_space<vmem>>, %arg3: memref<1x96xf32, #tpu.memory_space<vmem>>, %arg4: memref<32x32xf32, #tpu.memory_space<vmem>>, %arg5: memref<1x32xf32, #tpu.memory_space<vmem>>, %arg6: memref<34x32xf32, #tpu.memory_space<vmem>>, %arg7: memref<2x4x17x17xf32, #tpu.memory_space<vmem>>) attributes {dimension_semantics = [], scalar_prefetch = 0 : i64, scratch_operands = 0 : i64, tpu.core_type = #tpu.core_type<tc>} {
    %c0 = arith.constant 0 : index
    %c0_0 = arith.constant 0 : index
    %0 = vector.load %arg0[%c0, %c0_0] : memref<34x32xf32, #tpu.memory_space<vmem>>, vector<34x32xf32>
    %c0_1 = arith.constant 0 : index
    %c0_2 = arith.constant 0 : index
    %1 = vector.load %arg2[%c0_1, %c0_2] : memref<32x96xf32, #tpu.memory_space<vmem>>, vector<32x96xf32>
    %cst = arith.constant dense<0.000000e+00> : vector<34x96xf32>
    %2 = tpu.matmul %0, %1, %cst {dimension_numbers = #tpu.dot_dimension_numbers<[1], [0], [0], [1], [0, 0, 1, 1], [], []>} : vector<34x32xf32>, vector<32x96xf32>, vector<34x96xf32> -> vector<34x96xf32>
    %c0_3 = arith.constant 0 : index
    %c0_4 = arith.constant 0 : index
    %3 = vector.load %arg3[%c0_3, %c0_4] : memref<1x96xf32, #tpu.memory_space<vmem>>, vector<1x96xf32>
    %4 = vector.broadcast %3 : vector<1x96xf32> to vector<34x96xf32>
    %5 = arith.addf %2, %4 : vector<34x96xf32>
    %6 = vector.extract_strided_slice %5 {offsets = [0, 0], sizes = [34, 32], strides = [1, 1]} : vector<34x96xf32> to vector<34x32xf32>
    %cst_5 = arith.constant 0.353553385 : f32
    %7 = vector.broadcast %cst_5 : f32 to vector<34x32xf32>
    %8 = arith.mulf %6, %7 : vector<34x32xf32>
    %9 = vector.extract_strided_slice %5 {offsets = [0, 32], sizes = [34, 32], strides = [1, 1]} : vector<34x96xf32> to vector<34x32xf32>
    %c0_6 = arith.constant 0 : index
    %c0_7 = arith.constant 0 : index
    %10 = vector.load %arg1[%c0_6, %c0_7] : memref<34x32xf32, #tpu.memory_space<vmem>>, vector<34x32xf32>
    %11 = arith.addf %9, %10 : vector<34x32xf32>
    %12 = vector.extract_strided_slice %5 {offsets = [0, 64], sizes = [34, 32], strides = [1, 1]} : vector<34x96xf32> to vector<34x32xf32>
    %c0_8 = arith.constant 0 : index
    %c0_9 = arith.constant 0 : index
    %13 = vector.load %arg1[%c0_8, %c0_9] : memref<34x32xf32, #tpu.memory_space<vmem>>, vector<34x32xf32>
    %14 = arith.addf %12, %13 : vector<34x32xf32>
    %15 = vector.extract_strided_slice %8 {offsets = [0, 0], sizes = [17, 32], strides = [1, 1]} : vector<34x32xf32> to vector<17x32xf32>
    %16 = vector.extract_strided_slice %11 {offsets = [0, 0], sizes = [17, 32], strides = [1, 1]} : vector<34x32xf32> to vector<17x32xf32>
    %17 = vector.extract_strided_slice %14 {offsets = [0, 0], sizes = [17, 32], strides = [1, 1]} : vector<34x32xf32> to vector<17x32xf32>
    %18 = vector.extract_strided_slice %15 {offsets = [0, 0], sizes = [17, 8], strides = [1, 1]} : vector<17x32xf32> to vector<17x8xf32>
    %19 = vector.extract_strided_slice %16 {offsets = [0, 0], sizes = [17, 8], strides = [1, 1]} : vector<17x32xf32> to vector<17x8xf32>
    %20 = vector.extract_strided_slice %17 {offsets = [0, 0], sizes = [17, 8], strides = [1, 1]} : vector<17x32xf32> to vector<17x8xf32>
    %cst_10 = arith.constant dense<0.000000e+00> : vector<17x17xf32>
    %21 = tpu.matmul %18, %19, %cst_10 {dimension_numbers = #tpu.dot_dimension_numbers<[1], [1], [0], [0], [0, 0, 1, 0], [], []>} : vector<17x8xf32>, vector<17x8xf32>, vector<17x17xf32> -> vector<17x17xf32>
    %cst_11 = arith.constant dense<0xFF800000> : vector<17xf32>
    %22 = vector.multi_reduction <maximumf>, %21, %cst_11 [1] : vector<17x17xf32> to vector<17xf32>
    %23 = vector.shape_cast %22 : vector<17xf32> to vector<17x1xf32>
    %24 = vector.broadcast %23 : vector<17x1xf32> to vector<17x17xf32>
    %25 = arith.subf %21, %24 : vector<17x17xf32>
    %26 = math.exp %25 : vector<17x17xf32>
    %cst_12 = arith.constant dense<0.000000e+00> : vector<17xf32>
    %27 = vector.multi_reduction <add>, %26, %cst_12 [1] : vector<17x17xf32> to vector<17xf32>
    %28 = vector.shape_cast %27 : vector<17xf32> to vector<17x1xf32>
    %29 = tpu.reciprocal %28 : vector<17x1xf32> -> vector<17x1xf32>
    %30 = vector.broadcast %29 : vector<17x1xf32> to vector<17x17xf32>
    %31 = arith.mulf %26, %30 : vector<17x17xf32>
    %cst_13 = arith.constant dense<0.000000e+00> : vector<17x8xf32>
    %32 = tpu.matmul %31, %20, %cst_13 {dimension_numbers = #tpu.dot_dimension_numbers<[1], [0], [0], [1], [0, 0, 1, 1], [], []>} : vector<17x17xf32>, vector<17x8xf32>, vector<17x8xf32> -> vector<17x8xf32>
    %33 = vector.extract_strided_slice %15 {offsets = [0, 8], sizes = [17, 8], strides = [1, 1]} : vector<17x32xf32> to vector<17x8xf32>
    %34 = vector.extract_strided_slice %16 {offsets = [0, 8], sizes = [17, 8], strides = [1, 1]} : vector<17x32xf32> to vector<17x8xf32>
    %35 = vector.extract_strided_slice %17 {offsets = [0, 8], sizes = [17, 8], strides = [1, 1]} : vector<17x32xf32> to vector<17x8xf32>
    %cst_14 = arith.constant dense<0.000000e+00> : vector<17x17xf32>
    %36 = tpu.matmul %33, %34, %cst_14 {dimension_numbers = #tpu.dot_dimension_numbers<[1], [1], [0], [0], [0, 0, 1, 0], [], []>} : vector<17x8xf32>, vector<17x8xf32>, vector<17x17xf32> -> vector<17x17xf32>
    %cst_15 = arith.constant dense<0xFF800000> : vector<17xf32>
    %37 = vector.multi_reduction <maximumf>, %36, %cst_15 [1] : vector<17x17xf32> to vector<17xf32>
    %38 = vector.shape_cast %37 : vector<17xf32> to vector<17x1xf32>
    %39 = vector.broadcast %38 : vector<17x1xf32> to vector<17x17xf32>
    %40 = arith.subf %36, %39 : vector<17x17xf32>
    %41 = math.exp %40 : vector<17x17xf32>
    %cst_16 = arith.constant dense<0.000000e+00> : vector<17xf32>
    %42 = vector.multi_reduction <add>, %41, %cst_16 [1] : vector<17x17xf32> to vector<17xf32>
    %43 = vector.shape_cast %42 : vector<17xf32> to vector<17x1xf32>
    %44 = tpu.reciprocal %43 : vector<17x1xf32> -> vector<17x1xf32>
    %45 = vector.broadcast %44 : vector<17x1xf32> to vector<17x17xf32>
    %46 = arith.mulf %41, %45 : vector<17x17xf32>
    %cst_17 = arith.constant dense<0.000000e+00> : vector<17x8xf32>
    %47 = tpu.matmul %46, %35, %cst_17 {dimension_numbers = #tpu.dot_dimension_numbers<[1], [0], [0], [1], [0, 0, 1, 1], [], []>} : vector<17x17xf32>, vector<17x8xf32>, vector<17x8xf32> -> vector<17x8xf32>
    %48 = vector.extract_strided_slice %15 {offsets = [0, 16], sizes = [17, 8], strides = [1, 1]} : vector<17x32xf32> to vector<17x8xf32>
    %49 = vector.extract_strided_slice %16 {offsets = [0, 16], sizes = [17, 8], strides = [1, 1]} : vector<17x32xf32> to vector<17x8xf32>
    %50 = vector.extract_strided_slice %17 {offsets = [0, 16], sizes = [17, 8], strides = [1, 1]} : vector<17x32xf32> to vector<17x8xf32>
    %cst_18 = arith.constant dense<0.000000e+00> : vector<17x17xf32>
    %51 = tpu.matmul %48, %49, %cst_18 {dimension_numbers = #tpu.dot_dimension_numbers<[1], [1], [0], [0], [0, 0, 1, 0], [], []>} : vector<17x8xf32>, vector<17x8xf32>, vector<17x17xf32> -> vector<17x17xf32>
    %cst_19 = arith.constant dense<0xFF800000> : vector<17xf32>
    %52 = vector.multi_reduction <maximumf>, %51, %cst_19 [1] : vector<17x17xf32> to vector<17xf32>
    %53 = vector.shape_cast %52 : vector<17xf32> to vector<17x1xf32>
    %54 = vector.broadcast %53 : vector<17x1xf32> to vector<17x17xf32>
    %55 = arith.subf %51, %54 : vector<17x17xf32>
    %56 = math.exp %55 : vector<17x17xf32>
    %cst_20 = arith.constant dense<0.000000e+00> : vector<17xf32>
    %57 = vector.multi_reduction <add>, %56, %cst_20 [1] : vector<17x17xf32> to vector<17xf32>
    %58 = vector.shape_cast %57 : vector<17xf32> to vector<17x1xf32>
    %59 = tpu.reciprocal %58 : vector<17x1xf32> -> vector<17x1xf32>
    %60 = vector.broadcast %59 : vector<17x1xf32> to vector<17x17xf32>
    %61 = arith.mulf %56, %60 : vector<17x17xf32>
    %cst_21 = arith.constant dense<0.000000e+00> : vector<17x8xf32>
    %62 = tpu.matmul %61, %50, %cst_21 {dimension_numbers = #tpu.dot_dimension_numbers<[1], [0], [0], [1], [0, 0, 1, 1], [], []>} : vector<17x17xf32>, vector<17x8xf32>, vector<17x8xf32> -> vector<17x8xf32>
    %63 = vector.extract_strided_slice %15 {offsets = [0, 24], sizes = [17, 8], strides = [1, 1]} : vector<17x32xf32> to vector<17x8xf32>
    %64 = vector.extract_strided_slice %16 {offsets = [0, 24], sizes = [17, 8], strides = [1, 1]} : vector<17x32xf32> to vector<17x8xf32>
    %65 = vector.extract_strided_slice %17 {offsets = [0, 24], sizes = [17, 8], strides = [1, 1]} : vector<17x32xf32> to vector<17x8xf32>
    %cst_22 = arith.constant dense<0.000000e+00> : vector<17x17xf32>
    %66 = tpu.matmul %63, %64, %cst_22 {dimension_numbers = #tpu.dot_dimension_numbers<[1], [1], [0], [0], [0, 0, 1, 0], [], []>} : vector<17x8xf32>, vector<17x8xf32>, vector<17x17xf32> -> vector<17x17xf32>
    %cst_23 = arith.constant dense<0xFF800000> : vector<17xf32>
    %67 = vector.multi_reduction <maximumf>, %66, %cst_23 [1] : vector<17x17xf32> to vector<17xf32>
    %68 = vector.shape_cast %67 : vector<17xf32> to vector<17x1xf32>
    %69 = vector.broadcast %68 : vector<17x1xf32> to vector<17x17xf32>
    %70 = arith.subf %66, %69 : vector<17x17xf32>
    %71 = math.exp %70 : vector<17x17xf32>
    %cst_24 = arith.constant dense<0.000000e+00> : vector<17xf32>
    %72 = vector.multi_reduction <add>, %71, %cst_24 [1] : vector<17x17xf32> to vector<17xf32>
    %73 = vector.shape_cast %72 : vector<17xf32> to vector<17x1xf32>
    %74 = tpu.reciprocal %73 : vector<17x1xf32> -> vector<17x1xf32>
    %75 = vector.broadcast %74 : vector<17x1xf32> to vector<17x17xf32>
    %76 = arith.mulf %71, %75 : vector<17x17xf32>
    %cst_25 = arith.constant dense<0.000000e+00> : vector<17x8xf32>
    %77 = tpu.matmul %76, %65, %cst_25 {dimension_numbers = #tpu.dot_dimension_numbers<[1], [0], [0], [1], [0, 0, 1, 1], [], []>} : vector<17x17xf32>, vector<17x8xf32>, vector<17x8xf32> -> vector<17x8xf32>
    %78 = vector.shape_cast %31 : vector<17x17xf32> to vector<1x17x17xf32>
    %79 = vector.shape_cast %46 : vector<17x17xf32> to vector<1x17x17xf32>
    %80 = vector.shape_cast %61 : vector<17x17xf32> to vector<1x17x17xf32>
    %81 = vector.shape_cast %76 : vector<17x17xf32> to vector<1x17x17xf32>
    %82 = tpu.concatenate %78, %79, %80, %81 in 0 : vector<1x17x17xf32>, vector<1x17x17xf32>, vector<1x17x17xf32>, vector<1x17x17xf32> -> vector<4x17x17xf32>
    %c0_26 = arith.constant 0 : index
    %c0_27 = arith.constant 0 : index
    %c0_28 = arith.constant 0 : index
    %c0_29 = arith.constant 0 : index
    %83 = vector.load %arg7[%c0_26, %c0_27, %c0_28, %c0_29] : memref<2x4x17x17xf32, #tpu.memory_space<vmem>>, vector<1x4x17x17xf32>
    %84 = vector.shape_cast %83 : vector<1x4x17x17xf32> to vector<4x17x17xf32>
    %85 = vector.shape_cast %82 : vector<4x17x17xf32> to vector<1x4x17x17xf32>
    tpu.vector_store %arg7[%c0_26, %c0_27, %c0_28, %c0_29], %85 {strides = array<i32>} : memref<2x4x17x17xf32, #tpu.memory_space<vmem>>, vector<1x4x17x17xf32>,
    %86 = tpu.concatenate %32, %47, %62, %77 in 1 : vector<17x8xf32>, vector<17x8xf32>, vector<17x8xf32>, vector<17x8xf32> -> vector<17x32xf32>
    %87 = vector.extract_strided_slice %8 {offsets = [17, 0], sizes = [17, 32], strides = [1, 1]} : vector<34x32xf32> to vector<17x32xf32>
    %88 = vector.extract_strided_slice %11 {offsets = [17, 0], sizes = [17, 32], strides = [1, 1]} : vector<34x32xf32> to vector<17x32xf32>
    %89 = vector.extract_strided_slice %14 {offsets = [17, 0], sizes = [17, 32], strides = [1, 1]} : vector<34x32xf32> to vector<17x32xf32>
    %90 = vector.extract_strided_slice %87 {offsets = [0, 0], sizes = [17, 8], strides = [1, 1]} : vector<17x32xf32> to vector<17x8xf32>
    %91 = vector.extract_strided_slice %88 {offsets = [0, 0], sizes = [17, 8], strides = [1, 1]} : vector<17x32xf32> to vector<17x8xf32>
    %92 = vector.extract_strided_slice %89 {offsets = [0, 0], sizes = [17, 8], strides = [1, 1]} : vector<17x32xf32> to vector<17x8xf32>
    %cst_30 = arith.constant dense<0.000000e+00> : vector<17x17xf32>
    %93 = tpu.matmul %90, %91, %cst_30 {dimension_numbers = #tpu.dot_dimension_numbers<[1], [1], [0], [0], [0, 0, 1, 0], [], []>} : vector<17x8xf32>, vector<17x8xf32>, vector<17x17xf32> -> vector<17x17xf32>
    %cst_31 = arith.constant dense<0xFF800000> : vector<17xf32>
    %94 = vector.multi_reduction <maximumf>, %93, %cst_31 [1] : vector<17x17xf32> to vector<17xf32>
    %95 = vector.shape_cast %94 : vector<17xf32> to vector<17x1xf32>
    %96 = vector.broadcast %95 : vector<17x1xf32> to vector<17x17xf32>
    %97 = arith.subf %93, %96 : vector<17x17xf32>
    %98 = math.exp %97 : vector<17x17xf32>
    %cst_32 = arith.constant dense<0.000000e+00> : vector<17xf32>
    %99 = vector.multi_reduction <add>, %98, %cst_32 [1] : vector<17x17xf32> to vector<17xf32>
    %100 = vector.shape_cast %99 : vector<17xf32> to vector<17x1xf32>
    %101 = tpu.reciprocal %100 : vector<17x1xf32> -> vector<17x1xf32>
    %102 = vector.broadcast %101 : vector<17x1xf32> to vector<17x17xf32>
    %103 = arith.mulf %98, %102 : vector<17x17xf32>
    %cst_33 = arith.constant dense<0.000000e+00> : vector<17x8xf32>
    %104 = tpu.matmul %103, %92, %cst_33 {dimension_numbers = #tpu.dot_dimension_numbers<[1], [0], [0], [1], [0, 0, 1, 1], [], []>} : vector<17x17xf32>, vector<17x8xf32>, vector<17x8xf32> -> vector<17x8xf32>
    %105 = vector.extract_strided_slice %87 {offsets = [0, 8], sizes = [17, 8], strides = [1, 1]} : vector<17x32xf32> to vector<17x8xf32>
    %106 = vector.extract_strided_slice %88 {offsets = [0, 8], sizes = [17, 8], strides = [1, 1]} : vector<17x32xf32> to vector<17x8xf32>
    %107 = vector.extract_strided_slice %89 {offsets = [0, 8], sizes = [17, 8], strides = [1, 1]} : vector<17x32xf32> to vector<17x8xf32>
    %cst_34 = arith.constant dense<0.000000e+00> : vector<17x17xf32>
    %108 = tpu.matmul %105, %106, %cst_34 {dimension_numbers = #tpu.dot_dimension_numbers<[1], [1], [0], [0], [0, 0, 1, 0], [], []>} : vector<17x8xf32>, vector<17x8xf32>, vector<17x17xf32> -> vector<17x17xf32>
    %cst_35 = arith.constant dense<0xFF800000> : vector<17xf32>
    %109 = vector.multi_reduction <maximumf>, %108, %cst_35 [1] : vector<17x17xf32> to vector<17xf32>
    %110 = vector.shape_cast %109 : vector<17xf32> to vector<17x1xf32>
    %111 = vector.broadcast %110 : vector<17x1xf32> to vector<17x17xf32>
    %112 = arith.subf %108, %111 : vector<17x17xf32>
    %113 = math.exp %112 : vector<17x17xf32>
    %cst_36 = arith.constant dense<0.000000e+00> : vector<17xf32>
    %114 = vector.multi_reduction <add>, %113, %cst_36 [1] : vector<17x17xf32> to vector<17xf32>
    %115 = vector.shape_cast %114 : vector<17xf32> to vector<17x1xf32>
    %116 = tpu.reciprocal %115 : vector<17x1xf32> -> vector<17x1xf32>
    %117 = vector.broadcast %116 : vector<17x1xf32> to vector<17x17xf32>
    %118 = arith.mulf %113, %117 : vector<17x17xf32>
    %cst_37 = arith.constant dense<0.000000e+00> : vector<17x8xf32>
    %119 = tpu.matmul %118, %107, %cst_37 {dimension_numbers = #tpu.dot_dimension_numbers<[1], [0], [0], [1], [0, 0, 1, 1], [], []>} : vector<17x17xf32>, vector<17x8xf32>, vector<17x8xf32> -> vector<17x8xf32>
    %120 = vector.extract_strided_slice %87 {offsets = [0, 16], sizes = [17, 8], strides = [1, 1]} : vector<17x32xf32> to vector<17x8xf32>
    %121 = vector.extract_strided_slice %88 {offsets = [0, 16], sizes = [17, 8], strides = [1, 1]} : vector<17x32xf32> to vector<17x8xf32>
    %122 = vector.extract_strided_slice %89 {offsets = [0, 16], sizes = [17, 8], strides = [1, 1]} : vector<17x32xf32> to vector<17x8xf32>
    %cst_38 = arith.constant dense<0.000000e+00> : vector<17x17xf32>
    %123 = tpu.matmul %120, %121, %cst_38 {dimension_numbers = #tpu.dot_dimension_numbers<[1], [1], [0], [0], [0, 0, 1, 0], [], []>} : vector<17x8xf32>, vector<17x8xf32>, vector<17x17xf32> -> vector<17x17xf32>
    %cst_39 = arith.constant dense<0xFF800000> : vector<17xf32>
    %124 = vector.multi_reduction <maximumf>, %123, %cst_39 [1] : vector<17x17xf32> to vector<17xf32>
    %125 = vector.shape_cast %124 : vector<17xf32> to vector<17x1xf32>
    %126 = vector.broadcast %125 : vector<17x1xf32> to vector<17x17xf32>
    %127 = arith.subf %123, %126 : vector<17x17xf32>
    %128 = math.exp %127 : vector<17x17xf32>
    %cst_40 = arith.constant dense<0.000000e+00> : vector<17xf32>
    %129 = vector.multi_reduction <add>, %128, %cst_40 [1] : vector<17x17xf32> to vector<17xf32>
    %130 = vector.shape_cast %129 : vector<17xf32> to vector<17x1xf32>
    %131 = tpu.reciprocal %130 : vector<17x1xf32> -> vector<17x1xf32>
    %132 = vector.broadcast %131 : vector<17x1xf32> to vector<17x17xf32>
    %133 = arith.mulf %128, %132 : vector<17x17xf32>
    %cst_41 = arith.constant dense<0.000000e+00> : vector<17x8xf32>
    %134 = tpu.matmul %133, %122, %cst_41 {dimension_numbers = #tpu.dot_dimension_numbers<[1], [0], [0], [1], [0, 0, 1, 1], [], []>} : vector<17x17xf32>, vector<17x8xf32>, vector<17x8xf32> -> vector<17x8xf32>
    %135 = vector.extract_strided_slice %87 {offsets = [0, 24], sizes = [17, 8], strides = [1, 1]} : vector<17x32xf32> to vector<17x8xf32>
    %136 = vector.extract_strided_slice %88 {offsets = [0, 24], sizes = [17, 8], strides = [1, 1]} : vector<17x32xf32> to vector<17x8xf32>
    %137 = vector.extract_strided_slice %89 {offsets = [0, 24], sizes = [17, 8], strides = [1, 1]} : vector<17x32xf32> to vector<17x8xf32>
    %cst_42 = arith.constant dense<0.000000e+00> : vector<17x17xf32>
    %138 = tpu.matmul %135, %136, %cst_42 {dimension_numbers = #tpu.dot_dimension_numbers<[1], [1], [0], [0], [0, 0, 1, 0], [], []>} : vector<17x8xf32>, vector<17x8xf32>, vector<17x17xf32> -> vector<17x17xf32>
    %cst_43 = arith.constant dense<0xFF800000> : vector<17xf32>
    %139 = vector.multi_reduction <maximumf>, %138, %cst_43 [1] : vector<17x17xf32> to vector<17xf32>
    %140 = vector.shape_cast %139 : vector<17xf32> to vector<17x1xf32>
    %141 = vector.broadcast %140 : vector<17x1xf32> to vector<17x17xf32>
    %142 = arith.subf %138, %141 : vector<17x17xf32>
    %143 = math.exp %142 : vector<17x17xf32>
    %cst_44 = arith.constant dense<0.000000e+00> : vector<17xf32>
    %144 = vector.multi_reduction <add>, %143, %cst_44 [1] : vector<17x17xf32> to vector<17xf32>
    %145 = vector.shape_cast %144 : vector<17xf32> to vector<17x1xf32>
    %146 = tpu.reciprocal %145 : vector<17x1xf32> -> vector<17x1xf32>
    %147 = vector.broadcast %146 : vector<17x1xf32> to vector<17x17xf32>
    %148 = arith.mulf %143, %147 : vector<17x17xf32>
    %cst_45 = arith.constant dense<0.000000e+00> : vector<17x8xf32>
    %149 = tpu.matmul %148, %137, %cst_45 {dimension_numbers = #tpu.dot_dimension_numbers<[1], [0], [0], [1], [0, 0, 1, 1], [], []>} : vector<17x17xf32>, vector<17x8xf32>, vector<17x8xf32> -> vector<17x8xf32>
    %150 = vector.shape_cast %103 : vector<17x17xf32> to vector<1x17x17xf32>
    %151 = vector.shape_cast %118 : vector<17x17xf32> to vector<1x17x17xf32>
    %152 = vector.shape_cast %133 : vector<17x17xf32> to vector<1x17x17xf32>
    %153 = vector.shape_cast %148 : vector<17x17xf32> to vector<1x17x17xf32>
    %154 = tpu.concatenate %150, %151, %152, %153 in 0 : vector<1x17x17xf32>, vector<1x17x17xf32>, vector<1x17x17xf32>, vector<1x17x17xf32> -> vector<4x17x17xf32>
    %c1 = arith.constant 1 : index
    %c0_46 = arith.constant 0 : index
    %c0_47 = arith.constant 0 : index
    %c0_48 = arith.constant 0 : index
    %155 = vector.load %arg7[%c1, %c0_46, %c0_47, %c0_48] : memref<2x4x17x17xf32, #tpu.memory_space<vmem>>, vector<1x4x17x17xf32>
    %156 = vector.shape_cast %155 : vector<1x4x17x17xf32> to vector<4x17x17xf32>
    %157 = vector.shape_cast %154 : vector<4x17x17xf32> to vector<1x4x17x17xf32>
    tpu.vector_store %arg7[%c1, %c0_46, %c0_47, %c0_48], %157 {strides = array<i32>} : memref<2x4x17x17xf32, #tpu.memory_space<vmem>>, vector<1x4x17x17xf32>,
    %158 = tpu.concatenate %104, %119, %134, %149 in 1 : vector<17x8xf32>, vector<17x8xf32>, vector<17x8xf32>, vector<17x8xf32> -> vector<17x32xf32>
    %159 = tpu.concatenate %86, %158 in 0 : vector<17x32xf32>, vector<17x32xf32> -> vector<34x32xf32>
    %c0_49 = arith.constant 0 : index
    %c0_50 = arith.constant 0 : index
    %160 = vector.load %arg4[%c0_49, %c0_50] : memref<32x32xf32, #tpu.memory_space<vmem>>, vector<32x32xf32>
    %cst_51 = arith.constant dense<0.000000e+00> : vector<34x32xf32>
    %161 = tpu.matmul %159, %160, %cst_51 {dimension_numbers = #tpu.dot_dimension_numbers<[1], [0], [0], [1], [0, 0, 1, 1], [], []>} : vector<34x32xf32>, vector<32x32xf32>, vector<34x32xf32> -> vector<34x32xf32>
    %c0_52 = arith.constant 0 : index
    %c0_53 = arith.constant 0 : index
    %162 = vector.load %arg5[%c0_52, %c0_53] : memref<1x32xf32, #tpu.memory_space<vmem>>, vector<1x32xf32>
    %163 = vector.broadcast %162 : vector<1x32xf32> to vector<34x32xf32>
    %164 = arith.addf %161, %163 : vector<34x32xf32>
    %c0_54 = arith.constant 0 : index
    %c0_55 = arith.constant 0 : index
    %165 = vector.load %arg6[%c0_54, %c0_55] : memref<34x32xf32, #tpu.memory_space<vmem>>, vector<34x32xf32>
    tpu.vector_store %arg6[%c0_54, %c0_55], %164 {strides = array<i32>} : memref<34x32xf32, #tpu.memory_space<vmem>>, vector<34x32xf32>,
    return
  }
}

</mosaic_0001>

<bundles_post_ra>
// kernel: tpu_custom_call.1
= control target key start
LH: loop header
LB: loop body
LE: loop exit
PB: predicated region body
PF: predicated region fallthrough
CT: control target
= control target key end

     0   :  { %v3138_v0 = vmov 0.0|0.0   ;;  %vm3139_vm0 = vmmov 0   ;;  %v3140_v4 = vmov 0.0   ;;  %vm41_vm1 = vcmask 261120   ;;  %s3144_s30 = smov 80   ;;  %s3145_s8 = smov 120   ;;  %s4101_s2 = inlined_call_operand.vmem [shape: f32[32,96], index: 2, kind: input, shape index: {}]   ;;  %s4102_s1 = inlined_call_operand.vmem [shape: f32[34,32], index: 1, kind: input, shape index: {}]   ;;  %s4103_s0 = inlined_call_operand.vmem [shape: f32[34,32], index: 0, kind: input, shape index: {}]   ;;  %s4104_s3 = inlined_call_operand.vmem [shape: f32[1,96], index: 3, kind: input, shape index: {}]   ;;  %s4105_s7 = inlined_call_operand.vmem [shape: f32[2,4,17,17], index: 7, kind: output, shape index: {1}]   ;;  %s4106_s4 = inlined_call_operand.vmem [shape: f32[32,32], index: 4, kind: input, shape index: {}]   ;;  %s4107_s5 = inlined_call_operand.vmem [shape: f32[1,32], index: 5, kind: input, shape index: {}]   ;;  %s4108_s6 = inlined_call_operand.vmem [shape: f32[34,32], index: 6, kind: output, shape index: {0}]  }
   0x1   :  { %2872 = vmatprep.subr.bf16.mxu0 %v3138_v0  ;;  %v30_v1 = vld [vmem:[%s4101_s2] sm:$0xff]  ;;  %v31_v2 = vld [vmem:[%s4101_s2 + $0x8] sm:$0xff]  ;;  %v32_v3 = vld [vmem:[%s4101_s2 + $0x10] sm:$0xff]  ;;  %2594 = vmatprep.mubr.msk.f32.mxu0 %vm3139_vm0, %v3140_v4  ;;  %s3146_s9 = smov 72   ;;  %vm1214_vm2 = vcmask 1046528   ;;  %s3147_s10 = smov 112  }
   0x2   :  { %v2873_v5 = vpack.c.bf16 %v31_v2, %v30_v1  ;;  %v33_v6 = vld [vmem:[%s4101_s2 + $0x18] sm:$0xff]  ;;  %2940 = vmatprep.subr.bf16.mxu1 %v3138_v0  ;;  %2603 = vmatprep.mubr.msk.f32.mxu1 %vm3139_vm0, %v3140_v4  ;;  %v3217_v8 = vld [vmem:[%s4102_s1] sm:$0xff]  ;;  %v3222_v9 = vld [vmem:[%s4102_s1 + $0x10] sm:$0xff]  ;;  %s3141_s2 = smov 32   ;;  %s3148_s11 = smov 104   ;;  %vm211_vm3 = vcmask 64512  }
   0x3   :  { %v2876_v7 = vpack.c.bf16 %v33_v6, %v32_v3  ;;  %162 = vrot.lane.b32.xlu0 %v3217_v8, %s3141_s2  ;;  %166 = vrot.lane.b32.xlu1 %v3222_v9, %s3141_s2  ;;  %v3231_v10 = vld [vmem:[%s4102_s1 + $0x8] sm:$0xff]  ;;  %v3236_v11 = vld [vmem:[%s4102_s1 + $0x18] sm:$0xff]  ;;  %s3149_s12 = smov 64   ;;  %vm3377_vm4 = vmpackc.low %vm211_vm3, %vm211_vm3  ;;  %s3151_s13 = smov 48   ;;  %vm362_vm5 = vcmask 1040384   ;;  %vm307_vm6 = vcmask 138240  }
   0x4   :  { %2874 = vmatpush3.bf16.msra.mxu0 %v2873_v5  ;;  %2942 = vmatpush3.bf16.msra.mxu1 %v2873_v5  ;;  %v25_v12 = vld [vmem:[%s4103_s0] sm:$0xff]  ;;  %v28_v13 = vld [vmem:[%s4103_s0 + $0x18] sm:$0xff]  ;;  %v26_v15 = vld [vmem:[%s4103_s0 + $0x8] sm:$0xff]  ;;  %s3152_s14 = smov 40   ;;  %vm314_vm7 = vcmask 131072   ;;  %s3154_s17 = smov 16  }
   0x5   :  { %2875 = vmatprep.subr.bf16.mxu0 %v3138_v0  ;;  %2941 = vmatprep.subr.bf16.mxu1 %v3138_v0  ;;  %v3253_v14 = vld [vmem:[%s4102_s1 + $0x20] sm:$0x3]  ;;  %v27_v17 = vld [vmem:[%s4103_s0 + $0x10] sm:$0xff]  ;;  %vm1204_vm8 = vcmask 130048   ;;  %vm1208_vm9 = vcmask 195584   ;;  %vm2358_vm10 = vcmask 254976  }
   0x6   :  { %v29_v16 = vld [vmem:[%s4103_s0 + $0x20] sm:$0x3]  ;;  %s3142_s0 = smov 96  }
   0x7   :  { %164 = vrot.lane.b32.xlu0 %v3231_v10, %s3141_s2  ;;  %168 = vrot.lane.b32.xlu1 %v3236_v11, %s3141_s2  ;;  %v2368_v19 = vld [vmem:[%s4104_s3] ss:$0 sm:$0xff]  ;;  %s3143_s3 = smov 88  }
   0x8   :  { %2877 = vmatpush3.bf16.msra.mxu0 %v2876_v7  ;;  %2943 = vmatpush3.bf16.msra.mxu1 %v2876_v7 }
   0x9   :  { %2878 = vmatprep.subr.bf16.mxu1 %v3138_v0  ;;  %2885 = vmatprep.subr.bf16.mxu0 %v3138_v0 }
   0xb   :  { %2595 = vmatmul.mubr.msk.f32.vlgmr.msra.gmra.mrb[0].mxu0 %vm41_vm1, %v25_v12  ;;  %2604 = vmatmul.mubr.msk.f32.vlgmr.msra.gmra.mrb[0].mxu1 %vm41_vm1, %v28_v13 }
   0xc   :  { %2597 = vmatprep.mubr.msk.f32.mxu0 %vm3139_vm0, %v3140_v4  ;;  %2606 = vmatprep.mubr.msk.f32.mxu1 %vm3139_vm0, %v3140_v4 }
   0xd   :  { %170 = vrot.lane.b32.xlu0 %v3253_v14, %s3141_s2  ;;  %s3150_s2 = smov 56  }
   0xf   :  { %2598 = vmatmul.mubr.msk.f32.gmra.mrb[2].mxu0 %vm41_vm1, %v26_v15  ;;  %2607 = vmatmul.mubr.msk.f32.gmra.mrb[2].mxu1 %vm41_vm1, %v29_v16 }
  0x10   :  { %2600 = vmatprep.mubr.msk.f32.mxu0 %vm3139_vm0, %v3140_v4  ;;  %2615 = vmatprep.mubr.msk.f32.mxu1 %vm3139_vm0, %v3140_v4 }
  0x13   :  { %2601 = vmatmul.mubr.msk.f32.gmra.mrb[4].mxu0 %vm41_vm1, %v27_v17 }
  0x14   :  { %2645 = vmatprep.mubr.msk.f32.mxu0 %vm3139_vm0, %v3140_v4 }
  0x75   :  { %v163_v18 = vpop.permute.xlu0 %162  ;;  %v167_v34 = vpop.permute.xlu1 %166 }
  0x79   :  { %v165_v25 = vpop.permute.xlu0 %164  ;;  %v169_v44 = vpop.permute.xlu1 %168 }
  0x7f   :  { %v171_v45 = vpop.permute.xlu0 %170 }
  0xde   :  { %v123_v20 = vpop.f32.mrb[0].mxu0  ;;  %v138_v21 = vpop.f32.mrb[0].mxu1 }
  0xdf   :  { %v2596_v22 = vpop.f32.mrb[1].mxu0  ;;  %v2605_v23 = vpop.f32.mrb[1].mxu1  ;;  %v3281_v24 = vadd.f32 %v2368_v19, %v123_v20  ;;  %v3303_v41 = vadd.f32 %v2368_v19, %v138_v21 }
  0xe1   :  { %v177_v31 = vadd.f32 %v163_v18, %v3281_v24  ;;  %v3295_v39 = vmul.f32 0.35355338, %v3281_v24  ;;  %v180_v46 = vadd.f32 %v169_v44, %v3303_v41  ;;  %v150_v54 = vmul.f32 0.35355338, %v3303_v41 }
  0xe2   :  { %v128_v26 = vpop.f32.mrb[2].mxu0  ;;  %v143_v27 = vpop.f32.mrb[2].mxu1 }
  0xe3   :  { %v3283_v28 = vadd.f32 %v2368_v19, %v128_v26  ;;  %v2599_v29 = vpop.f32.mrb[3].mxu0  ;;  %v2608_v30 = vpop.f32.mrb[3].mxu1  ;;  %v3305_v42 = vadd.f32 %v2368_v19, %v143_v27  ;;  %v1223_v49 = vrot.slane %v180_v46, 1  ;;  %v1216_v56 = vrot.slane %v150_v54, 1 }
  0xe5   :  { %v178_v32 = vadd.f32 %v165_v25, %v3283_v28  ;;  %v3299_v40 = vmul.f32 0.35355338, %v3283_v28  ;;  %v181_v47 = vadd.f32 %v171_v45, %v3305_v42  ;;  %v151_v55 = vmul.f32 0.35355338, %v3305_v42 }
  0xe6   :  { %v133_v33 = vpop.f32.mrb[4].mxu0 }
  0xe7   :  { %v3287_v35 = vadd.f32 %v2368_v19, %v133_v33  ;;  %v2962_v36 = vpack.i.bf16 %v178_v32, %v177_v31  ;;  %v2602_v37 = vpop.f32.mrb[5].mxu0  ;;  %v1225_v50 = vrot.slane %v181_v47, 1  ;;  %v3335_v57 = vrot.slane %v151_v55, 1 }
  0xe9   :  { %v179_v38 = vadd.f32 %v167_v34, %v3287_v35  ;;  %2963 = vrot.lane.b32.xlu1 %v2962_v36, %s3142_s0  ;;  %v3308_v43 = vmul.f32 0.35355338, %v3287_v35  ;;  %v1226_v52 = vsel %vm1214_vm2, %v1223_v49, %v1225_v50  ;;  %v3345_v60 = vsel %vm1214_vm2, %v1216_v56, %v3335_v57 }
  0xeb   :  { %209 = vrot.lane.b32.xlu0 %v179_v38, %s3142_s0  ;;  %v1222_v48 = vrot.slane %v179_v38, 1  ;;  %v1215_v58 = vrot.slane %v3308_v43, 1 }
  0xed   :  { %2968 = vrot.lane.b32.xlu1 %v2962_v36, %s3143_s3  ;;  %v1224_v51 = vsel %vm1214_vm2, %v1222_v48, %v1223_v49  ;;  %v3341_v59 = vsel %vm1214_vm2, %v1215_v58, %v1216_v56 }
  0xee   :  { %v2982_v53 = vpack.i.bf16 %v1226_v52, %v1224_v51 }
  0xef   :  { %455 = vrot.lane.b32.xlu0 %v179_v38, %s3143_s3 }
  0xf1   :  { %2973 = vrot.lane.b32.xlu1 %v2962_v36, %s3144_s30 }
  0xf3   :  { %445 = vrot.lane.b32.xlu0 %v3295_v39, %s3145_s8 }
  0xf5   :  { %447 = vrot.lane.b32.xlu1 %v3299_v40, %s3145_s8 }
  0xf7   :  { %449 = vrot.lane.b32.xlu0 %v3308_v43, %s3145_s8 }
  0xf9   :  { %691 = vrot.lane.b32.xlu1 %v179_v38, %s3144_s30 }
  0xfb   :  { %2978 = vrot.lane.b32.xlu0 %v2962_v36, %s3146_s9 }
  0xfd   :  { %681 = vrot.lane.b32.xlu1 %v3295_v39, %s3147_s10 }
  0xff   :  { %683 = vrot.lane.b32.xlu0 %v3299_v40, %s3147_s10 }
 0x101   :  { %685 = vrot.lane.b32.xlu1 %v3308_v43, %s3147_s10 }
 0x103   :  { %927 = vrot.lane.b32.xlu0 %v179_v38, %s3146_s9 }
 0x105   :  { %2983 = vrot.lane.b32.xlu1 %v2982_v53, %s3142_s0 }
 0x107   :  { %917 = vrot.lane.b32.xlu0 %v3295_v39, %s3148_s11 }
 0x109   :  { %919 = vrot.lane.b32.xlu1 %v3299_v40, %s3148_s11 }
 0x10b   :  { %921 = vrot.lane.b32.xlu0 %v3308_v43, %s3148_s11 }
 0x10d   :  { %1231 = vrot.lane.b32.xlu1 %v1225_v50, %s3142_s0 }
 0x10f   :  { %2988 = vrot.lane.b32.xlu0 %v2982_v53, %s3143_s3 }
 0x111   :  { %1474 = vrot.lane.b32.xlu1 %v1225_v50, %s3143_s3 }
 0x113   :  { %2993 = vrot.lane.b32.xlu0 %v2982_v53, %s3144_s30 }
 0x115   :  { %1464 = vrot.lane.b32.xlu1 %v3341_v59, %s3145_s8 }
 0x117   :  { %1466 = vrot.lane.b32.xlu0 %v3345_v60, %s3145_s8 }
 0x119   :  { %1468 = vrot.lane.b32.xlu1 %v3335_v57, %s3145_s8 }
 0x11b   :  { %1710 = vrot.lane.b32.xlu0 %v1225_v50, %s3144_s30 }
 0x11d   :  { %2998 = vrot.lane.b32.xlu1 %v2982_v53, %s3146_s9 }
 0x11f   :  { %1700 = vrot.lane.b32.xlu0 %v3341_v59, %s3147_s10 }
 0x121   :  { %1702 = vrot.lane.b32.xlu1 %v3345_v60, %s3147_s10 }
 0x123   :  { %1704 = vrot.lane.b32.xlu0 %v3335_v57, %s3147_s10 }
 0x125   :  { %1946 = vrot.lane.b32.xlu1 %v1225_v50, %s3146_s9 }
 0x127   :  { %1936 = vrot.lane.b32.xlu0 %v3341_v59, %s3148_s11 }
 0x129   :  { %1938 = vrot.lane.b32.xlu1 %v3345_v60, %s3148_s11 }
 0x12b   :  { %1940 = vrot.lane.b32.xlu0 %v3335_v57, %s3148_s11 }
 0x12d   :  { %184 = vrot.lane.b32.xlu1 %v3231_v10, %s3149_s12 }
 0x12f   :  { %182 = vrot.lane.b32.xlu0 %v3217_v8, %s3149_s12 }
 0x131   :  { %188 = vrot.lane.b32.xlu1 %v3236_v11, %s3149_s12 }
 0x133   :  { %186 = vrot.lane.b32.xlu0 %v3222_v9, %s3149_s12 }
 0x137   :  { %190 = vrot.lane.b32.xlu0 %v3253_v14, %s3149_s12 }
 0x15b   :  { %v2964_v61 = vpop.permute.xlu1 %2963 }
 0x15c   :  { %v2966_v62 = vunpack.i.h.bf16 %v2964_v61  ;;  %v2965_v63 = vunpack.i.l.bf16 %v2964_v61 }
 0x15d   :  { %v210_v1 = vpop.permute.xlu0 %209 }
 0x15e   :  { %v2879_v3 = vpack.c.bf16 %v2966_v62, %v2965_v63 }
 0x15f   :  { %v2969_v5 = vpop.permute.xlu1 %2968 }
 0x160   :  { %v2971_v6 = vunpack.i.h.bf16 %v2969_v5  ;;  %v2970_v7 = vunpack.i.l.bf16 %v2969_v5  ;;  %2881 = vmatpush3.bf16.xpose.msk.msra.mxu1 %vm3377_vm4, %v2879_v3 }
 0x161   :  { %v456_v8 = vpop.permute.xlu0 %455  ;;  %2613 = vmatprep.subr.mxu1 %v3140_v4 }
 0x162   :  { %v2886_v9 = vpack.c.bf16 %v2971_v6, %v2970_v7 }
 0x163   :  { %v2974_v10 = vpop.permute.xlu1 %2973 }
 0x164   :  { %2888 = vmatpush3.bf16.xpose.msk.msra.mxu0 %vm3377_vm4, %v2886_v9  ;;  %v2976_v14 = vunpack.i.h.bf16 %v2974_v10  ;;  %v2975_v15 = vunpack.i.l.bf16 %v2974_v10 }
 0x165   :  { %v446_v11 = vpop.permute.xlu0 %445  ;;  %2643 = vmatprep.subr.mxu0 %v3140_v4 }
 0x166   :  { %v2893_v18 = vpack.c.bf16 %v2976_v14, %v2975_v15 }
 0x167   :  { %v448_v12 = vpop.permute.xlu1 %447 }
 0x168   :  { %2614 = vmatpush3.xpose.msk.msra.mxu1 %vm211_vm3, %v210_v1 }
 0x169   :  { %v450_v13 = vpop.permute.xlu0 %449  ;;  %2882 = vmatprep.subr.bf16.mxu1 %v3138_v0 }
 0x16b   :  { %v692_v16 = vpop.permute.xlu1 %691  ;;  %2616 = vmatmul.mubr.msk.f32.vlgmr.msra.gmra.mrb[4].mxu1 %vm211_vm3, %v3295_v39 }
 0x16c   :  { %2644 = vmatpush3.xpose.msk.msra.mxu0 %vm211_vm3, %v456_v8  ;;  %2618 = vmatprep.mubr.msk.f32.mxu1 %vm3139_vm0, %v3140_v4 }
 0x16d   :  { %v2979_v17 = vpop.permute.xlu0 %2978  ;;  %2892 = vmatprep.subr.bf16.mxu0 %v3138_v0 }
 0x16e   :  { %v2981_v23 = vunpack.i.h.bf16 %v2979_v17  ;;  %v2980_v25 = vunpack.i.l.bf16 %v2979_v17 }
 0x16f   :  { %v682_v19 = vpop.permute.xlu1 %681  ;;  %2619 = vmatmul.mubr.msk.f32.gmra.mrb[6].mxu1 %vm211_vm3, %v3299_v40  ;;  %2646 = vmatmul.mubr.msk.f32.vlgmr.msra.gmra.mrb[6].mxu0 %vm211_vm3, %v446_v11 }
 0x170   :  { %2895 = vmatpush3.bf16.xpose.msk.msra.mxu0 %vm3377_vm4, %v2893_v18  ;;  %2621 = vmatprep.mubr.msk.f32.mxu1 %vm3139_vm0, %v3140_v4  ;;  %v2900_v29 = vpack.c.bf16 %v2981_v23, %v2980_v25 }
 0x171   :  { %v684_v20 = vpop.permute.xlu0 %683  ;;  %2648 = vmatprep.mubr.msk.f32.mxu0 %vm3139_vm0, %v3140_v4  ;;  %2673 = vmatprep.subr.mxu0 %v3140_v4 }
 0x173   :  { %2649 = vmatmul.mubr.msk.f32.gmra.mrb[8].mxu0 %vm211_vm3, %v448_v12  ;;  %v686_v21 = vpop.permute.xlu1 %685  ;;  %2622 = vmatmul.mubr.msk.f32.gmra.mrb[8].mxu1 %vm211_vm3, %v3308_v43 }
 0x174   :  { %2651 = vmatprep.mubr.msk.f32.mxu0 %vm3139_vm0, %v3140_v4  ;;  %2630 = vmatprep.mubr.msk.f32.mxu1 %vm3139_vm0, %v3140_v4 }
 0x175   :  { %v928_v22 = vpop.permute.xlu0 %927 }
 0x177   :  { %v2984_v26 = vpop.permute.xlu1 %2983  ;;  %2652 = vmatmul.mubr.msk.f32.gmra.mrb[10].mxu0 %vm211_vm3, %v450_v13 }
 0x178   :  { %2674 = vmatpush3.xpose.msk.msra.mxu0 %vm211_vm3, %v692_v16  ;;  %2675 = vmatprep.mubr.msk.f32.mxu0 %vm3139_vm0, %v3140_v4  ;;  %v2986_v34 = vunpack.i.h.bf16 %v2984_v26  ;;  %v2985_v36 = vunpack.i.l.bf16 %v2984_v26 }
 0x179   :  { %v918_v27 = vpop.permute.xlu0 %917  ;;  %2899 = vmatprep.subr.bf16.mxu0 %v3138_v0 }
 0x17a   :  { %v2907_v39 = vpack.c.bf16 %v2986_v34, %v2985_v36 }
 0x17b   :  { %v920_v30 = vpop.permute.xlu1 %919  ;;  %2676 = vmatmul.mubr.msk.f32.vlgmr.msra.gmra.mrb[12].mxu0 %vm211_vm3, %v682_v19 }
 0x17c   :  { %2902 = vmatpush3.bf16.xpose.msk.msra.mxu0 %vm3377_vm4, %v2900_v29  ;;  %2678 = vmatprep.mubr.msk.f32.mxu0 %vm3139_vm0, %v3140_v4 }
 0x17d   :  { %v922_v31 = vpop.permute.xlu0 %921  ;;  %2703 = vmatprep.subr.mxu0 %v3140_v4 }
 0x17f   :  { %v1232_v32 = vpop.permute.xlu1 %1231  ;;  %2679 = vmatmul.mubr.msk.f32.gmra.mrb[14].mxu0 %vm211_vm3, %v684_v20 }
 0x180   :  { %2681 = vmatprep.mubr.msk.f32.mxu0 %vm3139_vm0, %v3140_v4 }
 0x181   :  { %v2989_v33 = vpop.permute.xlu0 %2988 }
 0x182   :  { %v2991_v46 = vunpack.i.h.bf16 %v2989_v33  ;;  %v2990_v47 = vunpack.i.l.bf16 %v2989_v33 }
 0x183   :  { %v1475_v37 = vpop.permute.xlu1 %1474  ;;  %2682 = vmatmul.mubr.msk.f32.gmra.mrb[16].mxu0 %vm211_vm3, %v686_v21 }
 0x184   :  { %2704 = vmatpush3.xpose.msk.msra.mxu0 %vm211_vm3, %v928_v22  ;;  %2705 = vmatprep.mubr.msk.f32.mxu0 %vm3139_vm0, %v3140_v4  ;;  %v2914_v50 = vpack.c.bf16 %v2991_v46, %v2990_v47 }
 0x185   :  { %v2994_v38 = vpop.permute.xlu0 %2993  ;;  %2906 = vmatprep.subr.bf16.mxu0 %v3138_v0 }
 0x186   :  { %v2996_v55 = vunpack.i.h.bf16 %v2994_v38  ;;  %v2995_v56 = vunpack.i.l.bf16 %v2994_v38 }
 0x187   :  { %2706 = vmatmul.mubr.msk.f32.vlgmr.msra.gmra.mrb[18].mxu0 %vm211_vm3, %v918_v27  ;;  %v1465_v40 = vpop.permute.xlu1 %1464 }
 0x188   :  { %2909 = vmatpush3.bf16.xpose.msk.msra.mxu0 %vm3377_vm4, %v2907_v39  ;;  %2708 = vmatprep.mubr.msk.f32.mxu0 %vm3139_vm0, %v3140_v4  ;;  %v2921_v61 = vpack.c.bf16 %v2996_v55, %v2995_v56 }
 0x189   :  { %v1467_v43 = vpop.permute.xlu0 %1466  ;;  %2733 = vmatprep.subr.mxu0 %v3140_v4 }
 0x18b   :  { %2709 = vmatmul.mubr.msk.f32.gmra.mrb[20].mxu0 %vm211_vm3, %v920_v30  ;;  %v1469_v44 = vpop.permute.xlu1 %1468 }
 0x18c   :  { %2711 = vmatprep.mubr.msk.f32.mxu0 %vm3139_vm0, %v3140_v4 }
 0x18d   :  { %v1711_v45 = vpop.permute.xlu0 %1710 }
 0x18f   :  { %2712 = vmatmul.mubr.msk.f32.gmra.mrb[22].mxu0 %vm211_vm3, %v922_v31  ;;  %v2999_v48 = vpop.permute.xlu1 %2998 }
 0x190   :  { %2734 = vmatpush3.xpose.msk.msra.mxu0 %vm211_vm3, %v1232_v32  ;;  %2735 = vmatprep.mubr.msk.f32.mxu0 %vm3139_vm0, %v3140_v4  ;;  %v3001_v6 = vunpack.i.h.bf16 %v2999_v48  ;;  %v3000_v7 = vunpack.i.l.bf16 %v2999_v48 }
 0x191   :  { %v1701_v49 = vpop.permute.xlu0 %1700  ;;  %2913 = vmatprep.subr.bf16.mxu0 %v3138_v0 }
 0x192   :  { %v2928_v9 = vpack.c.bf16 %v3001_v6, %v3000_v7 }
 0x193   :  { %v1703_v51 = vpop.permute.xlu1 %1702  ;;  %2736 = vmatmul.mubr.msk.f32.vlgmr.msra.gmra.mrb[24].mxu0 %vm211_vm3, %v3341_v59 }
 0x194   :  { %2916 = vmatpush3.bf16.xpose.msk.msra.mxu0 %vm3377_vm4, %v2914_v50  ;;  %2738 = vmatprep.mubr.msk.f32.mxu0 %vm3139_vm0, %v3140_v4 }
 0x195   :  { %v1705_v52 = vpop.permute.xlu0 %1704  ;;  %2763 = vmatprep.subr.mxu0 %v3140_v4 }
 0x197   :  { %v1947_v53 = vpop.permute.xlu1 %1946  ;;  %2739 = vmatmul.mubr.msk.f32.gmra.mrb[26].mxu0 %vm211_vm3, %v3345_v60 }
 0x198   :  { %2741 = vmatprep.mubr.msk.f32.mxu0 %vm3139_vm0, %v3140_v4 }
 0x199   :  { %v1937_v54 = vpop.permute.xlu0 %1936 }
 0x19b   :  { %v1939_v58 = vpop.permute.xlu1 %1938  ;;  %2742 = vmatmul.mubr.msk.f32.gmra.mrb[28].mxu0 %vm211_vm3, %v3335_v57 }
 0x19c   :  { %2764 = vmatpush3.xpose.msk.msra.mxu0 %vm211_vm3, %v1475_v37  ;;  %2765 = vmatprep.mubr.msk.f32.mxu0 %vm3139_vm0, %v3140_v4 }
 0x19d   :  { %v1941_v59 = vpop.permute.xlu0 %1940  ;;  %2920 = vmatprep.subr.bf16.mxu0 %v3138_v0 }
 0x19f   :  { %v185_v60 = vpop.permute.xlu1 %184  ;;  %2766 = vmatmul.mubr.msk.f32.vlgmr.msra.gmra.mrb[30].mxu0 %vm211_vm3, %v1465_v40 }
 0x1a0   :  { %2923 = vmatpush3.bf16.xpose.msk.msra.mxu0 %vm3377_vm4, %v2921_v61  ;;  %2768 = vmatprep.mubr.msk.f32.mxu0 %vm3139_vm0, %v3140_v4  ;;  %v198_v57 = vadd.f32 %v185_v60, %v3283_v28 }
 0x1a1   :  { %v183_v62 = vpop.permute.xlu0 %182  ;;  %2793 = vmatprep.subr.mxu0 %v3140_v4 }
 0x1a2   :  { %v197_v63 = vadd.f32 %v183_v62, %v3281_v24 }
 0x1a3   :  { %2769 = vmatmul.mubr.msk.f32.gmra.mrb[32].mxu0 %vm211_vm3, %v1467_v43  ;;  %v189_v3 = vpop.permute.xlu1 %188 }
 0x1a4   :  { %v3002_v1 = vpack.i.bf16 %v198_v57, %v197_v63  ;;  %2771 = vmatprep.mubr.msk.f32.mxu0 %vm3139_vm0, %v3140_v4  ;;  %v200_v28 = vadd.f32 %v189_v3, %v3303_v41 }
 0x1a5   :  { %v187_v5 = vpop.permute.xlu0 %186 }
 0x1a6   :  { %v199_v8 = vadd.f32 %v187_v5, %v3287_v35  ;;  %3003 = vrot.lane.b32.xlu1 %v3002_v1, %s3149_s12  ;;  %v1361_v41 = vrot.slane %v200_v28, 1 }
 0x1a7   :  { %2772 = vmatmul.mubr.msk.f32.gmra.mrb[34].mxu0 %vm211_vm3, %v1469_v44 }
 0x1a8   :  { %349 = vrot.lane.b32.xlu0 %v199_v8, %s3149_s12  ;;  %2794 = vmatpush3.xpose.msk.msra.mxu0 %vm211_vm3, %v1711_v45  ;;  %v1360_v35 = vrot.slane %v199_v8, 1 }
 0x1a9   :  { %v191_v24 = vpop.permute.xlu0 %190  ;;  %2795 = vmatprep.mubr.msk.f32.mxu0 %vm3139_vm0, %v3140_v4  ;;  %2927 = vmatprep.subr.bf16.mxu0 %v3138_v0 }
 0x1aa   :  { %v201_v10 = vadd.f32 %v191_v24, %v3305_v42  ;;  %586 = vrot.lane.b32.xlu1 %v199_v8, %s3150_s2  ;;  %v1362_v42 = vsel %vm1214_vm2, %v1360_v35, %v1361_v41 }
 0x1ab   :  { %2796 = vmatmul.mubr.msk.f32.vlgmr.msra.gmra.mrb[36].mxu0 %vm211_vm3, %v1701_v49 }
 0x1ac   :  { %v3485_v11 = vrot.slane %v201_v10, 1  ;;  %3008 = vrot.lane.b32.xlu0 %v3002_v1, %s3150_s2  ;;  %2930 = vmatpush3.bf16.xpose.msk.msra.mxu0 %vm3377_vm4, %v2928_v9 }
 0x1ad   :  { %2798 = vmatprep.mubr.msk.f32.mxu0 %vm3139_vm0, %v3140_v4  ;;  %2823 = vmatprep.subr.mxu0 %v3140_v4 }
 0x1ae   :  { %822 = vrot.lane.b32.xlu1 %v199_v8, %s3151_s13  ;;  %v1364_v12 = vsel %vm1214_vm2, %v1361_v41, %v3485_v11 }
 0x1af   :  { %2799 = vmatmul.mubr.msk.f32.gmra.mrb[38].mxu0 %vm211_vm3, %v1703_v51  ;;  %v3498_v13 = vpack.i.bf16 %v1364_v12, %v1362_v42 }
 0x1b0   :  { %3013 = vrot.lane.b32.xlu0 %v3002_v1, %s3151_s13  ;;  %2801 = vmatprep.mubr.msk.f32.mxu0 %vm3139_vm0, %v3140_v4 }
 0x1b2   :  { %3018 = vrot.lane.b32.xlu1 %v3002_v1, %s3152_s14 }
 0x1b3   :  { %2802 = vmatmul.mubr.msk.f32.gmra.mrb[40].mxu0 %vm211_vm3, %v1705_v52 }
 0x1b4   :  { %1058 = vrot.lane.b32.xlu0 %v199_v8, %s3152_s14  ;;  %2824 = vmatpush3.xpose.msk.msra.mxu0 %vm211_vm3, %v1947_v53 }
 0x1b5   :  { %2825 = vmatprep.mubr.msk.f32.mxu0 %vm3139_vm0, %v3140_v4  ;;  %2934 = vmatprep.subr.bf16.mxu0 %v3138_v0 }
 0x1b6   :  { %3023 = vrot.lane.b32.xlu1 %v3498_v13, %s3149_s12 }
 0x1b7   :  { %2826 = vmatmul.mubr.msk.f32.vlgmr.msra.gmra.mrb[42].mxu0 %vm211_vm3, %v1937_v54 }
 0x1b8   :  { %1369 = vrot.lane.b32.xlu0 %v3485_v11, %s3149_s12  ;;  %2828 = vmatprep.mubr.msk.f32.mxu0 %vm3139_vm0, %v3140_v4 }
 0x1bb   :  { %2829 = vmatmul.mubr.msk.f32.gmra.mrb[44].mxu0 %vm211_vm3, %v1939_v58 }
 0x1bc   :  { %2831 = vmatprep.mubr.msk.f32.mxu0 %vm3139_vm0, %v3140_v4 }
 0x1bf   :  { %2832 = vmatmul.mubr.msk.f32.gmra.mrb[46].mxu0 %vm211_vm3, %v1941_v59 }
 0x1c0   :  { %2857 = vmatprep.mubr.msk.f32.mxu0 %vm3139_vm0, %v3140_v4 }
 0x218   :  { %v3004_v2 = vpop.permute.xlu1 %3003 }
 0x219   :  { %v3006_v14 = vunpack.i.h.bf16 %v3004_v2  ;;  %v3005_v15 = vunpack.i.l.bf16 %v3004_v2 }
 0x21a   :  { %v350_v17 = vpop.permute.xlu0 %349 }
 0x21b   :  { %v2883_v16 = vpack.c.bf16 %v3006_v14, %v3005_v15 }
 0x21d   :  { %2884 = vmatpush3.bf16.msra.mxu1 %v2883_v16 }
 0x21e   :  { %2628 = vmatprep.subr.mxu1 %v3140_v4 }
 0x221   :  { %2629 = vmatpush3.msk.msra.mxu1 %vm362_vm5, %v350_v17 }
 0x222   :  { %2889 = vmatprep.subr.bf16.mxu1 %v3138_v0 }
 0x23e   :  { %v3526_v18 = vpop.f32.mrb[4].mxu1 }
 0x23f   :  { %v2617_v19 = vpop.f32.mrb[5].mxu1  ;;  %v308_v20 = vsel %vm307_vm6, %v3526_v18, -inf }
 0x240   :  { %309 = vmax.xlane.f32.xlu1 %v308_v20 }
 0x242   :  { %v3530_v21 = vpop.f32.mrb[6].mxu1  ;;  %v3532_v22 = vpop.f32.mrb[6].mxu0 }
 0x243   :  { %v2620_v23 = vpop.f32.mrb[7].mxu1  ;;  %v2647_v25 = vpop.f32.mrb[7].mxu0  ;;  %v311_v26 = vsel %vm307_vm6, %v3530_v21, -inf  ;;  %v549_v27 = vsel %vm307_vm6, %v3532_v22, -inf }
 0x244   :  { %312 = vmax.xlane.f32.xlu0 %v311_v26  ;;  %550 = vmax.xlane.f32.xlu1 %v549_v27 }
 0x246   :  { %v3538_v29 = vpop.f32.mrb[8].mxu1  ;;  %v3540_v30 = vpop.f32.mrb[8].mxu0 }
 0x247   :  { %v2623_v31 = vpop.f32.mrb[9].mxu1  ;;  %v2650_v32 = vpop.f32.mrb[9].mxu0  ;;  %v552_v33 = vsel %vm307_vm6, %v3540_v30, -inf  ;;  %v315_v37 = vsel %vm314_vm7, %v3538_v29, -inf }
 0x248   :  { %553 = vmax.xlane.f32.xlu0 %v552_v33 }
 0x24a   :  { %v3544_v34 = vpop.f32.mrb[10].mxu0 }
 0x24b   :  { %v2653_v36 = vpop.f32.mrb[11].mxu0  ;;  %v555_v5 = vsel %vm314_vm7, %v3544_v34, -inf }
 0x24c   :  { %316 = vmax.xlane.f32.xlu0 %v315_v37 }
 0x24e   :  { %v3548_v38 = vpop.f32.mrb[12].mxu0 }
 0x24f   :  { %v2677_v39 = vpop.f32.mrb[13].mxu0  ;;  %v785_v40 = vsel %vm307_vm6, %v3548_v38, -inf }
 0x250   :  { %786 = vmax.xlane.f32.xlu0 %v785_v40  ;;  %v3626_v40 = vpop.permute.xlu1 %586 }
 0x252   :  { %v3552_v43 = vpop.f32.mrb[14].mxu0 }
 0x253   :  { %v2680_v44 = vpop.f32.mrb[15].mxu0  ;;  %v788_v8 = vsel %vm307_vm6, %v3552_v43, -inf }
 0x254   :  { %v3628_v44 = vpop.permute.xlu0 %3008 }
 0x255   :  { %3028 = vrot.lane.b32.xlu1 %v3498_v13, %s3150_s2 }
 0x256   :  { %v3556_v45 = vpop.f32.mrb[16].mxu0 }
 0x257   :  { %v2683_v46 = vpop.f32.mrb[17].mxu0  ;;  %v791_v47 = vsel %vm314_vm7, %v3556_v45, -inf }
 0x258   :  { %792 = vmax.xlane.f32.xlu0 %v791_v47  ;;  %v3630_v46 = vpop.permute.xlu1 %822  ;;  %v3632_v47 = vpop.permute.xlu0 %3013 }
 0x25a   :  { %v3560_v48 = vpop.f32.mrb[18].mxu0 }
 0x25b   :  { %v2707_v49 = vpop.f32.mrb[19].mxu0  ;;  %v1021_v9 = vsel %vm307_vm6, %v3560_v48, -inf }
 0x25c   :  { %v3634_v49 = vpop.permute.xlu1 %3018 }
 0x25e   :  { %v3562_v50 = vpop.f32.mrb[20].mxu0 }
 0x25f   :  { %v2710_v51 = vpop.f32.mrb[21].mxu0  ;;  %v1024_v52 = vsel %vm307_vm6, %v3562_v50, -inf }
 0x260   :  { %1025 = vmax.xlane.f32.xlu0 %v1024_v52  ;;  %v3636_v51 = vpop.permute.xlu0 %1058  ;;  %v3638_v52 = vpop.permute.xlu1 %3023 }
 0x262   :  { %v3566_v53 = vpop.f32.mrb[22].mxu0 }
 0x263   :  { %v2713_v54 = vpop.f32.mrb[23].mxu0  ;;  %v1027_v41 = vsel %vm314_vm7, %v3566_v53, -inf }
 0x264   :  { %v3640_v54 = vpop.permute.xlu0 %1369 }
 0x266   :  { %v3568_v55 = vpop.f32.mrb[24].mxu0 }
 0x267   :  { %v2737_v56 = vpop.f32.mrb[25].mxu0  ;;  %v1325_v2 = vsel %vm307_vm6, %v3568_v55, -inf }
 0x26a   :  { %v3570_v58 = vpop.f32.mrb[26].mxu0 }
 0x26b   :  { %v2740_v59 = vpop.f32.mrb[27].mxu0  ;;  %v1328_v61 = vsel %vm307_vm6, %v3570_v58, -inf }
 0x26c   :  { %1329 = vmax.xlane.f32.xlu0 %v1328_v61 }
 0x26e   :  { %v3574_v60 = vpop.f32.mrb[28].mxu0 }
 0x26f   :  { %v2743_v62 = vpop.f32.mrb[29].mxu0  ;;  %v1331_v16 = vsel %vm314_vm7, %v3574_v60, -inf }
 0x272   :  { %v3576_v57 = vpop.f32.mrb[30].mxu0 }
 0x273   :  { %v2767_v63 = vpop.f32.mrb[31].mxu0  ;;  %v1568_v20 = vsel %vm307_vm6, %v3576_v57, -inf }
 0x276   :  { %v3578_v1 = vpop.f32.mrb[32].mxu0 }
 0x277   :  { %v2770_v3 = vpop.f32.mrb[33].mxu0  ;;  %v1571_v26 = vsel %vm307_vm6, %v3578_v1, -inf }
 0x279   :  { %556 = vmax.xlane.f32.xlu1 %v555_v5 }
 0x27a   :  { %v3582_v6 = vpop.f32.mrb[34].mxu0 }
 0x27b   :  { %v2773_v7 = vpop.f32.mrb[35].mxu0  ;;  %v1574_v27 = vsel %vm314_vm7, %v3582_v6, -inf }
 0x27d   :  { %789 = vmax.xlane.f32.xlu1 %v788_v8 }
 0x27e   :  { %v3586_v28 = vpop.f32.mrb[36].mxu0 }
 0x27f   :  { %v2797_v24 = vpop.f32.mrb[37].mxu0  ;;  %v1804_v31 = vsel %vm307_vm6, %v3586_v28, -inf }
 0x281   :  { %1022 = vmax.xlane.f32.xlu1 %v1021_v9 }
 0x282   :  { %1605 = vrot.lane.b32.xlu0 %v3485_v11, %s3150_s2  ;;  %v3592_v10 = vpop.f32.mrb[38].mxu0 }
 0x283   :  { %v2800_v35 = vpop.f32.mrb[39].mxu0  ;;  %v1807_v32 = vsel %vm307_vm6, %v3592_v10, -inf }
 0x285   :  { %1028 = vmax.xlane.f32.xlu1 %v1027_v41 }
 0x286   :  { %v3596_v42 = vpop.f32.mrb[40].mxu0 }
 0x287   :  { %v2803_v12 = vpop.f32.mrb[41].mxu0  ;;  %v1810_v33 = vsel %vm314_vm7, %v3596_v42, -inf }
 0x289   :  { %1326 = vmax.xlane.f32.xlu1 %v1325_v2 }
 0x28a   :  { %v3600_v14 = vpop.f32.mrb[42].mxu0 }
 0x28b   :  { %v2827_v15 = vpop.f32.mrb[43].mxu0  ;;  %v2040_v36 = vsel %vm307_vm6, %v3600_v14, -inf }
 0x28d   :  { %1332 = vmax.xlane.f32.xlu1 %v1331_v16 }
 0x28e   :  { %v3604_v17 = vpop.f32.mrb[44].mxu0 }
 0x28f   :  { %v2830_v19 = vpop.f32.mrb[45].mxu0  ;;  %v2043_v37 = vsel %vm307_vm6, %v3604_v17, -inf }
 0x291   :  { %1569 = vmax.xlane.f32.xlu1 %v1568_v20 }
 0x292   :  { %v3608_v23 = vpop.f32.mrb[46].mxu0 }
 0x293   :  { %v2833_v25 = vpop.f32.mrb[47].mxu0  ;;  %v2046_v39 = vsel %vm314_vm7, %v3608_v23, -inf }
 0x295   :  { %1572 = vmax.xlane.f32.xlu1 %v1571_v26 }
 0x299   :  { %1575 = vmax.xlane.f32.xlu1 %v1574_v27 }
 0x29d   :  { %1805 = vmax.xlane.f32.xlu1 %v1804_v31 }
 0x2a1   :  { %1808 = vmax.xlane.f32.xlu1 %v1807_v32  ;;  %1811 = vmax.xlane.f32.xlu0 %v1810_v33 }
 0x2a5   :  { %2041 = vmax.xlane.f32.xlu1 %v2040_v36 }
 0x2a9   :  { %2044 = vmax.xlane.f32.xlu1 %v2043_v37 }
 0x2ad   :  { %2047 = vmax.xlane.f32.xlu1 %v2046_v39 }
 0x2cd   :  { %v310_v56 = vpop.xlane.xlu1 %309 }
 0x2ce   :  { %v318_v59 = vsub.f32 %v3526_v18, %v310_v56 }
 0x2d0   :  { %v321_v61 = vmul.f32 1.442695, %v318_v59 }
 0x2d1   :  { %v313_v62 = vpop.xlane.xlu0 %312  ;;  %v551_v63 = vpop.xlane.xlu1 %550 }
 0x2d2   :  { %3042 = vpow2.f32 %v321_v61  ;;  %v319_v3 = vsub.f32 %v3530_v21, %v313_v62  ;;  %v558_v5 = vsub.f32 %v3532_v22, %v551_v63 }
 0x2d4   :  { %v323_v7 = vmul.f32 1.442695, %v319_v3  ;;  %v561_v8 = vmul.f32 1.442695, %v558_v5 }
 0x2d5   :  { %v554_v24 = vpop.xlane.xlu0 %553  ;;  %v3667_v26 = vpop.permute.xlu1 %3028 }
 0x2d6   :  { %3044 = vpow2.f32 %v323_v7  ;;  %v559_v9 = vsub.f32 %v3540_v30, %v554_v24 }
 0x2d7   :  { %3046 = vpow2.f32 %v561_v8 }
 0x2d8   :  { %v563_v35 = vmul.f32 1.442695, %v559_v9 }
 0x2d9   :  { %v317_v41 = vpop.xlane.xlu0 %316 }
 0x2da   :  { %3048 = vpow2.f32 %v563_v35  ;;  %v320_v18 = vsub.f32 %v3538_v29, %v317_v41 }
 0x2dc   :  { %v3647_v12 = vpop.eup %3042  ;;  %v325_v2 = vmul.f32 1.442695, %v320_v18 }
 0x2dd   :  { %v327_v21 = vsel %vm307_vm6, %v3647_v12, 0.0  ;;  %v787_v27 = vpop.xlane.xlu0 %786 }
 0x2de   :  { %3050 = vpow2.f32 %v325_v2  ;;  %328 = vadd.xlane.f32.xlu1 %v327_v21  ;;  %v794_v31 = vsub.f32 %v3548_v38, %v787_v27 }
 0x2e0   :  { %v3651_v22 = vpop.eup %3044  ;;  %v797_v37 = vmul.f32 1.442695, %v794_v31 }
 0x2e1   :  { %v3653_v15 = vpop.eup %3046  ;;  %v330_v30 = vsel %vm307_vm6, %v3651_v22, 0.0 }
 0x2e2   :  { %v567_v16 = vsel %vm307_vm6, %v3653_v15, 0.0  ;;  %331 = vadd.xlane.f32.xlu1 %v330_v30 }
 0x2e3   :  { %568 = vadd.xlane.f32.xlu0 %v567_v16 }
 0x2e4   :  { %v3659_v29 = vpop.eup %3048 }
 0x2e5   :  { %v570_v19 = vsel %vm307_vm6, %v3659_v29, 0.0  ;;  %v793_v32 = vpop.xlane.xlu0 %792 }
 0x2e6   :  { %571 = vadd.xlane.f32.xlu1 %v570_v19  ;;  %v796_v39 = vsub.f32 %v3556_v45, %v793_v32 }
 0x2e8   :  { %v3663_v20 = vpop.eup %3050  ;;  %v801_v63 = vmul.f32 1.442695, %v796_v39 }
 0x2e9   :  { %v333_v25 = vsel %vm314_vm7, %v3663_v20, 0.0 }
 0x2ea   :  { %334 = vadd.xlane.f32.xlu1 %v333_v25 }
 0x2ed   :  { %v1026_v59 = vpop.xlane.xlu0 %1025 }
 0x2ee   :  { %v1031_v3 = vsub.f32 %v3562_v50, %v1026_v59 }
 0x2f9   :  { %v1330_v24 = vpop.xlane.xlu0 %1329 }
 0x306   :  { %v557_v33 = vpop.xlane.xlu1 %556 }
 0x307   :  { %v560_v36 = vsub.f32 %v3544_v34, %v557_v33  ;;  %v1035_v34 = vmul.f32 1.442695, %v1031_v3 }
 0x309   :  { %v565_v56 = vmul.f32 1.442695, %v560_v36 }
 0x30a   :  { %v790_v61 = vpop.xlane.xlu1 %789 }
 0x30b   :  { %3052 = vpow2.f32 %v565_v56  ;;  %v795_v62 = vsub.f32 %v3552_v43, %v790_v61  ;;  %v1335_v43 = vsub.f32 %v3570_v58, %v1330_v24 }
 0x30c   :  { %3054 = vpow2.f32 %v797_v37 }
 0x30d   :  { %v799_v5 = vmul.f32 1.442695, %v795_v62  ;;  %v1339_v30 = vmul.f32 1.442695, %v1335_v43 }
 0x30e   :  { %v1023_v7 = vpop.xlane.xlu1 %1022 }
 0x30f   :  { %3056 = vpow2.f32 %v799_v5  ;;  %v1030_v38 = vsub.f32 %v3560_v48, %v1023_v7 }
 0x310   :  { %3058 = vpow2.f32 %v801_v63 }
 0x311   :  { %v1033_v8 = vmul.f32 1.442695, %v1030_v38 }
 0x312   :  { %v1029_v45 = vpop.xlane.xlu1 %1028 }
 0x313   :  { %3060 = vpow2.f32 %v1033_v8  ;;  %v1032_v9 = vsub.f32 %v3566_v53, %v1029_v45 }
 0x314   :  { %3062 = vpow2.f32 %v1035_v34 }
 0x315   :  { %v3676_v35 = vpop.eup %3052  ;;  %v1037_v41 = vmul.f32 1.442695, %v1032_v9 }
 0x316   :  { %v1327_v50 = vpop.xlane.xlu1 %1326  ;;  %v573_v18 = vsel %vm314_vm7, %v3676_v35, 0.0  ;;  %v3681_v2 = vpop.eup %3054 }
 0x317   :  { %3064 = vpow2.f32 %v1037_v41  ;;  %v1334_v48 = vsub.f32 %v3568_v55, %v1327_v50  ;;  %574 = vadd.xlane.f32.xlu0 %v573_v18  ;;  %v803_v19 = vsel %vm307_vm6, %v3681_v2, 0.0  ;;  %v3728_v41 = vpop.permute.xlu0 %1605 }
 0x319   :  { %v3684_v21 = vpop.eup %3056  ;;  %v1337_v53 = vmul.f32 1.442695, %v1334_v48 }
 0x31a   :  { %v1333_v16 = vpop.xlane.xlu1 %1332  ;;  %v806_v58 = vsel %vm307_vm6, %v3684_v21, 0.0  ;;  %v3690_v25 = vpop.eup %3058 }
 0x31b   :  { %3066 = vpow2.f32 %v1337_v53  ;;  %v1336_v27 = vsub.f32 %v3574_v60, %v1333_v16  ;;  %804 = vadd.xlane.f32.xlu0 %v803_v19  ;;  %807 = vadd.xlane.f32.xlu1 %v806_v58  ;;  %v809_v33 = vsel %vm314_vm7, %v3690_v25, 0.0 }
 0x31c   :  { %3068 = vpow2.f32 %v1339_v30 }
 0x31d   :  { %v3693_v55 = vpop.eup %3060  ;;  %v1341_v31 = vmul.f32 1.442695, %v1336_v27 }
 0x31e   :  { %v1570_v32 = vpop.xlane.xlu1 %1569  ;;  %v1039_v36 = vsel %vm307_vm6, %v3693_v55, 0.0  ;;  %v3699_v37 = vpop.eup %3062 }
 0x31f   :  { %v1577_v39 = vsub.f32 %v3576_v57, %v1570_v32  ;;  %810 = vadd.xlane.f32.xlu0 %v809_v33  ;;  %1040 = vadd.xlane.f32.xlu1 %v1039_v36  ;;  %3070 = vpow2.f32 %v1341_v31  ;;  %v1042_v59 = vsel %vm307_vm6, %v3699_v37, 0.0 }
 0x321   :  { %v3702_v60 = vpop.eup %3064  ;;  %v1580_v56 = vmul.f32 1.442695, %v1577_v39 }
 0x322   :  { %v1045_v61 = vsel %vm314_vm7, %v3702_v60, 0.0  ;;  %v1573_v8 = vpop.xlane.xlu1 %1572 }
 0x323   :  { %3072 = vpow2.f32 %v1580_v56  ;;  %1043 = vadd.xlane.f32.xlu0 %v1042_v59  ;;  %1046 = vadd.xlane.f32.xlu1 %v1045_v61  ;;  %v1578_v50 = vsub.f32 %v3578_v1, %v1573_v8 }
 0x325   :  { %v3708_v62 = vpop.eup %3066  ;;  %v1582_v53 = vmul.f32 1.442695, %v1578_v50 }
 0x326   :  { %v1343_v57 = vsel %vm307_vm6, %v3708_v62, 0.0  ;;  %v3712_v63 = vpop.eup %3068  ;;  %v1576_v24 = vpop.xlane.xlu1 %1575 }
 0x327   :  { %1344 = vadd.xlane.f32.xlu0 %v1343_v57  ;;  %v1346_v3 = vsel %vm307_vm6, %v3712_v63, 0.0  ;;  %v1579_v48 = vsub.f32 %v3582_v6, %v1576_v24  ;;  %3074 = vpow2.f32 %v1582_v53 }
 0x329   :  { %v3716_v5 = vpop.eup %3070  ;;  %v1584_v19 = vmul.f32 1.442695, %v1579_v48 }
 0x32a   :  { %v1349_v38 = vsel %vm314_vm7, %v3716_v5, 0.0  ;;  %v1806_v45 = vpop.xlane.xlu1 %1805 }
 0x32b   :  { %1347 = vadd.xlane.f32.xlu0 %v1346_v3  ;;  %v1813_v16 = vsub.f32 %v3586_v28, %v1806_v45  ;;  %3076 = vpow2.f32 %v1584_v19  ;;  %v3010_v19 = vunpack.i.l.bf16 %v3628_v44 }
 0x32d   :  { %v3718_v7 = vpop.eup %3072  ;;  %v1816_v31 = vmul.f32 1.442695, %v1813_v16  ;;  %v3011_v16 = vunpack.i.h.bf16 %v3628_v44 }
 0x32e   :  { %v1586_v34 = vsel %vm307_vm6, %v3718_v7, 0.0  ;;  %v1809_v9 = vpop.xlane.xlu1 %1808  ;;  %v1812_v30 = vpop.xlane.xlu0 %1811 }
 0x32f   :  { %1350 = vadd.xlane.f32.xlu0 %v1349_v38  ;;  %1587 = vadd.xlane.f32.xlu1 %v1586_v34  ;;  %v1815_v58 = vsub.f32 %v3596_v42, %v1812_v30  ;;  %v1814_v32 = vsub.f32 %v3592_v10, %v1809_v9  ;;  %3078 = vpow2.f32 %v1816_v31 }
 0x331   :  { %v1820_v33 = vmul.f32 1.442695, %v1815_v58  ;;  %v1818_v1 = vmul.f32 1.442695, %v1814_v32  ;;  %v3738_v42 = vpop.eup %3074  ;;  %v2890_v32 = vpack.c.bf16 %v3011_v16, %v3010_v19  ;;  %v3026_v19 = vunpack.i.h.bf16 %v3638_v52 }
 0x332   :  { %v2042_v43 = vpop.xlane.xlu1 %2041 }
 0x333   :  { %3080 = vpow2.f32 %v1820_v33  ;;  %v2049_v6 = vsub.f32 %v3600_v14, %v2042_v43 }
 0x334   :  { %3082 = vpow2.f32 %v1818_v1 }
 0x335   :  { %v2052_v28 = vmul.f32 1.442695, %v2049_v6  ;;  %v3740_v59 = vpop.eup %3076  ;;  %v3016_v6 = vunpack.i.h.bf16 %v3632_v47 }
 0x336   :  { %v2045_v18 = vpop.xlane.xlu1 %2044  ;;  %v1592_v14 = vsel %vm314_vm7, %v3740_v59, 0.0 }
 0x337   :  { %v2050_v56 = vsub.f32 %v3604_v17, %v2045_v18 }
 0x339   :  { %v2054_v10 = vmul.f32 1.442695, %v2050_v56  ;;  %v3742_v61 = vpop.eup %3078 }
 0x33a   :  { %v2048_v27 = vpop.xlane.xlu1 %2047  ;;  %v1822_v3 = vsel %vm307_vm6, %v3742_v61, 0.0 }
 0x33b   :  { %v2051_v36 = vsub.f32 %v3608_v23, %v2048_v27  ;;  %v1589_v23 = vsel %vm307_vm6, %v3738_v42, 0.0 }
 0x33d   :  { %v2056_v39 = vmul.f32 1.442695, %v2051_v36  ;;  %v3748_v57 = vpop.eup %3080 }
 0x33e   :  { %v3750_v17 = vpop.eup %3082  ;;  %v1828_v38 = vsel %vm314_vm7, %v3748_v57, 0.0 }
 0x33f   :  { %3084 = vpow2.f32 %v2056_v39  ;;  %v1825_v24 = vsel %vm307_vm6, %v3750_v17, 0.0  ;;  %v3015_v39 = vunpack.i.l.bf16 %v3632_v47 }
 0x340   :  { %3033 = vrot.lane.b32.xlu1 %v3498_v13, %s3151_s13  ;;  %3086 = vpow2.f32 %v2052_v28 }
 0x341   :  { %3088 = vpow2.f32 %v2054_v10 }
 0x345   :  { %1841 = vrot.lane.b32.xlu0 %v3485_v11, %s3151_s13 }
 0x349   :  { %v3756_v34 = vpop.eup %3084 }
 0x34a   :  { %v2064_v45 = vsel %vm314_vm7, %v3756_v34, 0.0  ;;  %v3762_v9 = vpop.eup %3086 }
 0x34b   :  { %v2058_v50 = vsel %vm307_vm6, %v3762_v9, 0.0  ;;  %v3766_v18 = vpop.eup %3088 }
 0x34c   :  { %v2061_v53 = vsel %vm307_vm6, %v3766_v18, 0.0 }
 0x364   :  { %1590 = vadd.xlane.f32.xlu0 %v1589_v23  ;;  %1593 = vadd.xlane.f32.xlu1 %v1592_v14  ;;  %v3021_v14 = vunpack.i.h.bf16 %v3634_v49 }
 0x368   :  { %1823 = vadd.xlane.f32.xlu0 %v1822_v3  ;;  %1829 = vadd.xlane.f32.xlu1 %v1828_v38  ;;  %v3020_v3 = vunpack.i.l.bf16 %v3634_v49 }
 0x36b   :  { %v329_v8 = vpop.xlane.xlu1 %328 }
 0x36c   :  { %3090 = vrcp.f32 %v329_v8  ;;  %1826 = vadd.xlane.f32.xlu0 %v1825_v24  ;;  %2065 = vadd.xlane.f32.xlu1 %v2064_v45  ;;  %v2904_v45 = vpack.c.bf16 %v3021_v14, %v3020_v3 }
 0x36f   :  { %v332_v43 = vpop.xlane.xlu1 %331 }
 0x370   :  { %v569_v48 = vpop.xlane.xlu0 %568  ;;  %3092 = vrcp.f32 %v332_v43  ;;  %2059 = vadd.xlane.f32.xlu0 %v2058_v50 }
 0x371   :  { %3094 = vrcp.f32 %v569_v48 }
 0x373   :  { %v572_v30 = vpop.xlane.xlu1 %571 }
 0x374   :  { %3096 = vrcp.f32 %v572_v30  ;;  %2062 = vadd.xlane.f32.xlu0 %v2061_v53 }
 0x376   :  { %v3091_v58 = vpop.eup %3090 }
 0x377   :  { %v339_v27 = vmul.f32 %v3091_v58, %v3647_v12  ;;  %v335_v31 = vpop.xlane.xlu1 %334  ;;  %v3025_v58 = vunpack.i.l.bf16 %v3638_v52 }
 0x378   :  { %3098 = vrcp.f32 %v335_v31 }
 0x379   :  { %1153 = vst.msk [vmem:[%s4105_s7] sm:$0xff] %vm307_vm6, %v339_v27  ;;  %2631 = vmatmul.mubr.msk.f32.vlgmr.msra.gmra.mrb[10].mxu1 %vm307_vm6, %v339_v27 }
 0x37a   :  { %v3093_v33 = vpop.eup %3092  ;;  %2891 = vmatpush3.bf16.msra.mxu1 %v2890_v32  ;;  %2633 = vmatprep.mubr.msk.f32.mxu1 %vm3139_vm0, %v3140_v4 }
 0x37b   :  { %v3095_v44 = vpop.eup %3094  ;;  %2658 = vmatprep.subr.mxu1 %v3140_v4  ;;  %v340_v12 = vmul.f32 %v3093_v33, %v3651_v22 }
 0x37c   :  { %v579_v36 = vmul.f32 %v3095_v44, %v3653_v15  ;;  %v3030_v44 = vunpack.i.l.bf16 %v3667_v26 }
 0x37d   :  { %2077 = vrot.lane.b32.xlu1 %v3485_v11, %s3152_s14  ;;  %2634 = vmatmul.mubr.msk.f32.gmra.mrb[12].mxu1 %vm307_vm6, %v340_v12  ;;  %1154 = vst.msk [vmem:[%s4105_s7 + $0x8] sm:$0xff] %vm307_vm6, %v340_v12 }
 0x37e   :  { %v3097_v1 = vpop.eup %3096  ;;  %1156 = vst.msk [vmem:[%s4105_s7 + $0x18] sm:$0xff] %vm307_vm6, %v579_v36  ;;  %2659 = vmatpush3.msk.msra.mxu1 %vm362_vm5, %v3626_v40  ;;  %2636 = vmatprep.mubr.msk.f32.mxu1 %vm3139_vm0, %v3140_v4  ;;  %v2897_v40 = vpack.c.bf16 %v3016_v6, %v3015_v39 }
 0x37f   :  { %2896 = vmatprep.subr.bf16.mxu1 %v3138_v0  ;;  %v580_v11 = vmul.f32 %v3097_v1, %v3659_v29 }
 0x381   :  { %1157 = vst.msk [vmem:[%s4105_s7 + $0x20] sm:$0xff] %vm307_vm6, %v580_v11 }
 0x382   :  { %v3099_v22 = vpop.eup %3098 }
 0x383   :  { %v341_v15 = vmul.f32 %v3099_v22, %v3663_v20 }
 0x385   :  { %2637 = vmatmul.mubr.msk.f32.gmra.mrb[14].mxu1 %vm307_vm6, %v341_v15  ;;  %1155 = vst.msk [vmem:[%s4105_s7 + $0x10] sm:$0x1] %vm314_vm7, %v341_v15 }
 0x386   :  { %2660 = vmatprep.mubr.msk.f32.mxu1 %vm3139_vm0, %v3140_v4 }
 0x389   :  { %2661 = vmatmul.mubr.msk.f32.vlgmr.msra.gmra.mrb[16].mxu1 %vm307_vm6, %v579_v36 }
 0x38a   :  { %2898 = vmatpush3.bf16.msra.mxu1 %v2897_v40  ;;  %3038 = vrot.lane.b32.xlu0 %v3498_v13, %s3152_s14 }
 0x38b   :  { %2663 = vmatprep.mubr.msk.f32.mxu1 %vm3139_vm0, %v3140_v4  ;;  %2688 = vmatprep.subr.mxu1 %v3140_v4 }
 0x38d   :  { %2664 = vmatmul.mubr.msk.f32.gmra.mrb[18].mxu1 %vm307_vm6, %v580_v11 }
 0x38e   :  { %2689 = vmatpush3.msk.msra.mxu1 %vm362_vm5, %v3630_v46  ;;  %2666 = vmatprep.mubr.msk.f32.mxu1 %vm3139_vm0, %v3140_v4 }
 0x38f   :  { %2903 = vmatprep.subr.bf16.mxu1 %v3138_v0 }
 0x3a4   :  { %v575_v47 = vpop.xlane.xlu0 %574 }
 0x3a5   :  { %3100 = vrcp.f32 %v575_v47 }
 0x3a8   :  { %v805_v29 = vpop.xlane.xlu0 %804  ;;  %v808_v20 = vpop.xlane.xlu1 %807 }
 0x3a9   :  { %3102 = vrcp.f32 %v805_v29 }
 0x3aa   :  { %3104 = vrcp.f32 %v808_v20 }
 0x3ac   :  { %v811_v13 = vpop.xlane.xlu0 %810  ;;  %v1041_v28 = vpop.xlane.xlu1 %1040 }
 0x3ad   :  { %3106 = vrcp.f32 %v811_v13 }
 0x3ae   :  { %3108 = vrcp.f32 %v1041_v28 }
 0x3af   :  { %v3101_v56 = vpop.eup %3100 }
 0x3b0   :  { %v1044_v10 = vpop.xlane.xlu0 %1043  ;;  %v1047_v23 = vpop.xlane.xlu1 %1046  ;;  %v581_v46 = vmul.f32 %v3101_v56, %v3676_v35 }
 0x3b1   :  { %3110 = vrcp.f32 %v1044_v10 }
 0x3b2   :  { %3112 = vrcp.f32 %v1047_v23  ;;  %2667 = vmatmul.mubr.msk.f32.gmra.mrb[20].mxu1 %vm307_vm6, %v581_v46  ;;  %1158 = vst.msk [vmem:[%s4105_s7 + $0x28] sm:$0x1] %vm314_vm7, %v581_v46 }
 0x3b3   :  { %v3103_v38 = vpop.eup %3102  ;;  %2690 = vmatprep.mubr.msk.f32.mxu1 %vm3139_vm0, %v3140_v4 }
 0x3b4   :  { %v3105_v8 = vpop.eup %3104  ;;  %v815_v35 = vmul.f32 %v3103_v38, %v3681_v2  ;;  %v1345_v24 = vpop.xlane.xlu0 %1344 }
 0x3b5   :  { %3114 = vrcp.f32 %v1345_v24  ;;  %v816_v49 = vmul.f32 %v3105_v8, %v3684_v21 }
 0x3b6   :  { %1159 = vst.msk [vmem:[%s4105_s7 + $0x30] sm:$0xff] %vm307_vm6, %v815_v35  ;;  %2691 = vmatmul.mubr.msk.f32.vlgmr.msra.gmra.mrb[22].mxu1 %vm307_vm6, %v815_v35 }
 0x3b7   :  { %v3107_v43 = vpop.eup %3106  ;;  %2905 = vmatpush3.bf16.msra.mxu1 %v2904_v45  ;;  %2693 = vmatprep.mubr.msk.f32.mxu1 %vm3139_vm0, %v3140_v4  ;;  %1160 = vst.msk [vmem:[%s4105_s7 + $0x38] sm:$0xff] %vm307_vm6, %v816_v49 }
 0x3b8   :  { %v3109_v2 = vpop.eup %3108  ;;  %v1348_v50 = vpop.xlane.xlu0 %1347  ;;  %2718 = vmatprep.subr.mxu1 %v3140_v4  ;;  %v817_v21 = vmul.f32 %v3107_v43, %v3690_v25 }
 0x3b9   :  { %v1051_v48 = vmul.f32 %v3109_v2, %v3693_v55  ;;  %3116 = vrcp.f32 %v1348_v50 }
 0x3ba   :  { %2694 = vmatmul.mubr.msk.f32.gmra.mrb[24].mxu1 %vm307_vm6, %v816_v49  ;;  %1161 = vst.msk [vmem:[%s4105_s7 + $0x40] sm:$0x1] %vm314_vm7, %v817_v21 }
 0x3bb   :  { %v3111_v30 = vpop.eup %3110  ;;  %1162 = vst.msk [vmem:[%s4105_s7 + $0x48] sm:$0xff] %vm307_vm6, %v1051_v48  ;;  %2719 = vmatpush3.msk.msra.mxu1 %vm362_vm5, %v3636_v51  ;;  %2696 = vmatprep.mubr.msk.f32.mxu1 %vm3139_vm0, %v3140_v4 }
 0x3bc   :  { %v3113_v25 = vpop.eup %3112  ;;  %v1351_v55 = vpop.xlane.xlu0 %1350  ;;  %2910 = vmatprep.subr.bf16.mxu1 %v3138_v0  ;;  %v1052_v16 = vmul.f32 %v3111_v30, %v3699_v37  ;;  %v2911_v37 = vpack.c.bf16 %v3026_v19, %v3025_v58  ;;  %v2242_v58 = vld [vmem:[%s4106_s4 + $0x10] sm:$0xff] }
 0x3bd   :  { %v1588_v53 = vpop.xlane.xlu1 %1587  ;;  %3118 = vrcp.f32 %v1351_v55  ;;  %v1053_v27 = vmul.f32 %v3113_v25, %v3702_v60  ;;  %v2240_v55 = vld [vmem:[%s4106_s4] sm:$0xff] }
 0x3be   :  { %3120 = vrcp.f32 %v1588_v53  ;;  %2697 = vmatmul.mubr.msk.f32.gmra.mrb[26].mxu1 %vm307_vm6, %v817_v21  ;;  %1163 = vst.msk [vmem:[%s4105_s7 + $0x50] sm:$0xff] %vm307_vm6, %v1052_v16  ;;  %v2241_v53 = vld [vmem:[%s4106_s4 + $0x8] sm:$0xff] }
 0x3bf   :  { %v3115_v51 = vpop.eup %3114  ;;  %2720 = vmatprep.mubr.msk.f32.mxu1 %vm3139_vm0, %v3140_v4  ;;  %1164 = vst.msk [vmem:[%s4105_s7 + $0x58] sm:$0x1] %vm314_vm7, %v1053_v27 }
 0x3c0   :  { %v1355_v52 = vmul.f32 %v3115_v51, %v3708_v62 }
 0x3c2   :  { %2454 = vst.msk [vmem:[%s4105_s7 + $0x60] sm:$0xff] %vm307_vm6, %v1355_v52  ;;  %2721 = vmatmul.mubr.msk.f32.vlgmr.msra.gmra.mrb[28].mxu1 %vm307_vm6, %v1051_v48 }
 0x3c3   :  { %v3117_v60 = vpop.eup %3116  ;;  %2912 = vmatpush3.bf16.msra.mxu1 %v2911_v37  ;;  %2723 = vmatprep.mubr.msk.f32.mxu1 %vm3139_vm0, %v3140_v4 }
 0x3c4   :  { %2748 = vmatprep.subr.mxu1 %v3140_v4  ;;  %v1356_v31 = vmul.f32 %v3117_v60, %v3712_v63  ;;  %v3031_v63 = vunpack.i.h.bf16 %v3667_v26  ;;  %v3034_v26 = vpop.permute.xlu1 %3033 }
 0x3c6   :  { %2724 = vmatmul.mubr.msk.f32.gmra.mrb[30].mxu1 %vm307_vm6, %v1052_v16  ;;  %2455 = vst.msk [vmem:[%s4105_s7 + $0x68] sm:$0xff] %vm307_vm6, %v1356_v31  ;;  %v2935_v16 = vpack.c.bf16 %v2241_v53, %v2240_v55 }
 0x3c7   :  { %v3119_v62 = vpop.eup %3118  ;;  %2749 = vmatpush3.msk.msra.mxu1 %vm362_vm5, %v3640_v54  ;;  %2726 = vmatprep.mubr.msk.f32.mxu1 %vm3139_vm0, %v3140_v4  ;;  %v2918_v54 = vpack.c.bf16 %v3031_v63, %v3030_v44 }
 0x3c8   :  { %v3121_v32 = vpop.eup %3120  ;;  %2917 = vmatprep.subr.bf16.mxu1 %v3138_v0  ;;  %v1357_v33 = vmul.f32 %v3119_v62, %v3716_v5  ;;  %v3036_v5 = vunpack.i.h.bf16 %v3034_v26  ;;  %2936 = vmatpush3.bf16.msra.mxu0 %v2935_v16 }
 0x3c9   :  { %v1598_v12 = vmul.f32 %v3121_v32, %v3718_v7  ;;  %v3035_v7 = vunpack.i.l.bf16 %v3034_v26  ;;  %2937 = vmatprep.subr.bf16.mxu0 %v3138_v0 }
 0x3ca   :  { %2727 = vmatmul.mubr.msk.f32.gmra.mrb[32].mxu1 %vm307_vm6, %v1053_v27  ;;  %2456 = vst.msk [vmem:[%s4105_s7 + $0x70] sm:$0x1] %vm314_vm7, %v1357_v33  ;;  %v2243_v27 = vld [vmem:[%s4106_s4 + $0x18] sm:$0xff]  ;;  %s3155_s4 = smov 24  }
 0x3cb   :  { %2457 = vst.msk [vmem:[%s4105_s7 + $0x78] sm:$0xff] %vm307_vm6, %v1598_v12  ;;  %2750 = vmatprep.mubr.msk.f32.mxu1 %vm3139_vm0, %v3140_v4  ;;  %v2925_v36 = vpack.c.bf16 %v3036_v5, %v3035_v7 }
 0x3ce   :  { %2751 = vmatmul.mubr.msk.f32.vlgmr.msra.gmra.mrb[34].mxu1 %vm307_vm6, %v1355_v52  ;;  %v2938_v52 = vpack.c.bf16 %v2243_v27, %v2242_v58 }
 0x3cf   :  { %2919 = vmatpush3.bf16.msra.mxu1 %v2918_v54  ;;  %2753 = vmatprep.mubr.msk.f32.mxu1 %vm3139_vm0, %v3140_v4 }
 0x3d0   :  { %2778 = vmatprep.subr.mxu1 %v3140_v4  ;;  %2939 = vmatpush3.bf16.msra.mxu0 %v2938_v52 }
 0x3d2   :  { %2754 = vmatmul.mubr.msk.f32.gmra.mrb[36].mxu1 %vm307_vm6, %v1356_v31 }
 0x3d3   :  { %2779 = vmatpush3.msk.msra.mxu1 %vm362_vm5, %v3728_v41  ;;  %2756 = vmatprep.mubr.msk.f32.mxu1 %vm3139_vm0, %v3140_v4  ;;  %v1842_v41 = vpop.permute.xlu0 %1841 }
 0x3d4   :  { %2924 = vmatprep.subr.bf16.mxu1 %v3138_v0 }
 0x3d6   :  { %2757 = vmatmul.mubr.msk.f32.gmra.mrb[38].mxu1 %vm307_vm6, %v1357_v33 }
 0x3d7   :  { %2780 = vmatprep.mubr.msk.f32.mxu1 %vm3139_vm0, %v3140_v4 }
 0x3da   :  { %2781 = vmatmul.mubr.msk.f32.vlgmr.msra.gmra.mrb[40].mxu1 %vm307_vm6, %v1598_v12 }
 0x3db   :  { %2926 = vmatpush3.bf16.msra.mxu1 %v2925_v36  ;;  %2783 = vmatprep.mubr.msk.f32.mxu1 %vm3139_vm0, %v3140_v4 }
 0x3dc   :  { %2808 = vmatprep.subr.mxu1 %v3140_v4 }
 0x3df   :  { %2809 = vmatpush3.msk.msra.mxu1 %vm362_vm5, %v1842_v41 }
 0x3e0   :  { %2931 = vmatprep.subr.bf16.mxu1 %v3138_v0 }
 0x3f1   :  { %v1591_v1 = vpop.xlane.xlu0 %1590  ;;  %v1594_v11 = vpop.xlane.xlu1 %1593 }
 0x3f2   :  { %3122 = vrcp.f32 %v1591_v1 }
 0x3f3   :  { %3124 = vrcp.f32 %v1594_v11 }
 0x3f5   :  { %v1824_v22 = vpop.xlane.xlu0 %1823  ;;  %v1830_v15 = vpop.xlane.xlu1 %1829 }
 0x3f6   :  { %3126 = vrcp.f32 %v1824_v22 }
 0x3f7   :  { %3128 = vrcp.f32 %v1830_v15 }
 0x3f9   :  { %v1827_v6 = vpop.xlane.xlu0 %1826  ;;  %v2066_v39 = vpop.xlane.xlu1 %2065 }
 0x3fa   :  { %3130 = vrcp.f32 %v1827_v6 }
 0x3fb   :  { %3132 = vrcp.f32 %v2066_v39 }
 0x3fc   :  { %v3123_v40 = vpop.eup %3122 }
 0x3fd   :  { %v3125_v47 = vpop.eup %3124  ;;  %v2060_v29 = vpop.xlane.xlu0 %2059  ;;  %v1599_v20 = vmul.f32 %v3123_v40, %v3738_v42 }
 0x3fe   :  { %3134 = vrcp.f32 %v2060_v29  ;;  %v1600_v13 = vmul.f32 %v3125_v47, %v3740_v59  ;;  %v2078_v24 = vpop.permute.xlu1 %2077 }
 0x3ff   :  { %2784 = vmatmul.mubr.msk.f32.gmra.mrb[42].mxu1 %vm307_vm6, %v1599_v20  ;;  %2458 = vst.msk [vmem:[%s4105_s7 + $0x80] sm:$0xff] %vm307_vm6, %v1599_v20 }
 0x400   :  { %v3127_v28 = vpop.eup %3126  ;;  %2786 = vmatprep.mubr.msk.f32.mxu1 %vm3139_vm0, %v3140_v4  ;;  %2459 = vst.msk [vmem:[%s4105_s7 + $0x88] sm:$0x1] %vm314_vm7, %v1600_v13 }
 0x401   :  { %v3129_v42 = vpop.eup %3128  ;;  %v1834_v56 = vmul.f32 %v3127_v28, %v3742_v61  ;;  %v2063_v59 = vpop.xlane.xlu0 %2062 }
 0x402   :  { %3136 = vrcp.f32 %v2063_v59  ;;  %v1836_v10 = vmul.f32 %v3129_v42, %v3748_v57 }
 0x403   :  { %2460 = vst.msk [vmem:[%s4105_s7 + $0x90] sm:$0xff] %vm307_vm6, %v1834_v56  ;;  %2787 = vmatmul.mubr.msk.f32.gmra.mrb[44].mxu1 %vm307_vm6, %v1600_v13 }
 0x404   :  { %v3131_v23 = vpop.eup %3130  ;;  %2810 = vmatprep.mubr.msk.f32.mxu1 %vm3139_vm0, %v3140_v4  ;;  %2462 = vst.msk [vmem:[%s4105_s7 + $0xa0] sm:$0x1] %vm314_vm7, %v1836_v10 }
 0x405   :  { %v3133_v61 = vpop.eup %3132  ;;  %v3039_v46 = vpop.permute.xlu0 %3038  ;;  %v1835_v57 = vmul.f32 %v3131_v23, %v3750_v17 }
 0x406   :  { %v3041_v14 = vunpack.i.h.bf16 %v3039_v46  ;;  %v3040_v3 = vunpack.i.l.bf16 %v3039_v46  ;;  %v2072_v38 = vmul.f32 %v3133_v61, %v3756_v34 }
 0x407   :  { %2811 = vmatmul.mubr.msk.f32.vlgmr.msra.gmra.mrb[46].mxu1 %vm307_vm6, %v1834_v56  ;;  %2461 = vst.msk [vmem:[%s4105_s7 + $0x98] sm:$0xff] %vm307_vm6, %v1835_v57 }
 0x408   :  { %v3135_v8 = vpop.eup %3134  ;;  %v2932_v35 = vpack.c.bf16 %v3041_v14, %v3040_v3  ;;  %2813 = vmatprep.mubr.msk.f32.mxu1 %vm3139_vm0, %v3140_v4  ;;  %2465 = vst.msk [vmem:[%s4105_s7 + $0xb8] sm:$0x1] %vm314_vm7, %v2072_v38 }
 0x409   :  { %v2070_v17 = vmul.f32 %v3135_v8, %v3762_v9 }
 0x40a   :  { %2933 = vmatpush3.bf16.msra.mxu1 %v2932_v35 }
 0x40b   :  { %2463 = vst.msk [vmem:[%s4105_s7 + $0xa8] sm:$0xff] %vm307_vm6, %v2070_v17  ;;  %2814 = vmatmul.mubr.msk.f32.gmra.mrb[48].mxu1 %vm307_vm6, %v1835_v57  ;;  %2838 = vmatprep.subr.mxu1 %v3140_v4 }
 0x40c   :  { %v3137_v34 = vpop.eup %3136  ;;  %2816 = vmatprep.mubr.msk.f32.mxu1 %vm3139_vm0, %v3140_v4 }
 0x40d   :  { %v2071_v45 = vmul.f32 %v3137_v34, %v3766_v18 }
 0x40e   :  { %2839 = vmatpush3.msk.msra.mxu1 %vm362_vm5, %v2078_v24 }
 0x40f   :  { %2817 = vmatmul.mubr.msk.f32.gmra.mrb[50].mxu1 %vm307_vm6, %v1836_v10  ;;  %2464 = vst.msk [vmem:[%s4105_s7 + $0xb0] sm:$0xff] %vm307_vm6, %v2071_v45  ;;  %s3153_s7 = smov 8  }
 0x410   :  { %2840 = vmatprep.mubr.msk.f32.mxu1 %vm3139_vm0, %v3140_v4 }
 0x413   :  { %2841 = vmatmul.mubr.msk.f32.vlgmr.msra.gmra.mrb[52].mxu1 %vm307_vm6, %v2070_v17 }
 0x414   :  { %2843 = vmatprep.mubr.msk.f32.mxu1 %vm3139_vm0, %v3140_v4 }
 0x417   :  { %2844 = vmatmul.mubr.msk.f32.gmra.mrb[54].mxu1 %vm307_vm6, %v2071_v45 }
 0x418   :  { %2846 = vmatprep.mubr.msk.f32.mxu1 %vm3139_vm0, %v3140_v4 }
 0x41b   :  { %2847 = vmatmul.mubr.msk.f32.gmra.mrb[56].mxu1 %vm307_vm6, %v2072_v38 }
 0x44c   :  { %v3999_v9 = vpop.f32.mrb[10].mxu1 }
 0x44d   :  { %v2632_v18 = vpop.f32.mrb[11].mxu1 }
 0x450   :  { %v4001_v49 = vpop.f32.mrb[12].mxu1 }
 0x451   :  { %v2635_v43 = vpop.f32.mrb[13].mxu1 }
 0x458   :  { %v4003_v2 = vpop.f32.mrb[14].mxu1 }
 0x459   :  { %v2638_v50 = vpop.f32.mrb[15].mxu1 }
 0x45c   :  { %v667_v21 = vpop.f32.mrb[16].mxu1 }
 0x45d   :  { %1168 = vrot.lane.b32.xlu0 %v667_v21, %s3153_s7  ;;  %v2662_v48 = vpop.f32.mrb[17].mxu1 }
 0x460   :  { %v672_v30 = vpop.f32.mrb[18].mxu1 }
 0x461   :  { %1170 = vrot.lane.b32.xlu0 %v672_v30, %s3153_s7  ;;  %v2665_v25 = vpop.f32.mrb[19].mxu1 }
 0x485   :  { %v677_v19 = vpop.f32.mrb[20].mxu1 }
 0x486   :  { %1172 = vrot.lane.b32.xlu0 %v677_v19, %s3153_s7  ;;  %v2668_v51 = vpop.f32.mrb[21].mxu1 }
 0x489   :  { %v903_v37 = vpop.f32.mrb[22].mxu1 }
 0x48a   :  { %1180 = vrot.lane.b32.xlu0 %v903_v37, %s3154_s17  ;;  %v2692_v60 = vpop.f32.mrb[23].mxu1 }
 0x48d   :  { %v908_v31 = vpop.f32.mrb[24].mxu1 }
 0x48e   :  { %1182 = vrot.lane.b32.xlu0 %v908_v31, %s3154_s17  ;;  %v2695_v0 = vpop.f32.mrb[25].mxu1 }
 0x491   :  { %v913_v62 = vpop.f32.mrb[26].mxu1 }
 0x492   :  { %1184 = vrot.lane.b32.xlu0 %v913_v62, %s3154_s17  ;;  %v2698_v32 = vpop.f32.mrb[27].mxu1 }
 0x495   :  { %v1139_v33 = vpop.f32.mrb[28].mxu1 }
 0x496   :  { %1192 = vrot.lane.b32.xlu0 %v1139_v33, %s3155_s4  ;;  %v2722_v63 = vpop.f32.mrb[29].mxu1 }
 0x499   :  { %v1144_v44 = vpop.f32.mrb[30].mxu1 }
 0x49a   :  { %1194 = vrot.lane.b32.xlu0 %v1144_v44, %s3155_s4  ;;  %v2725_v12 = vpop.f32.mrb[31].mxu1 }
 0x49d   :  { %v1149_v54 = vpop.f32.mrb[32].mxu1 }
 0x49e   :  { %1196 = vrot.lane.b32.xlu1 %v1149_v54, %s3155_s4  ;;  %v2728_v26 = vpop.f32.mrb[33].mxu1 }
 0x4a1   :  { %v1450_v5 = vpop.f32.mrb[34].mxu1 }
 0x4a2   :  { %v2752_v7 = vpop.f32.mrb[35].mxu1 }
 0x4a5   :  { %v4027_v36 = vpop.f32.mrb[36].mxu1 }
 0x4a6   :  { %v2755_v41 = vpop.f32.mrb[37].mxu1 }
 0x4a7   :  { %v2466_v41 = vld [vmem:[%s4107_s5] ss:$0 sm:$0xff] }
 0x4a9   :  { %v4029_v1 = vpop.f32.mrb[38].mxu1 }
 0x4aa   :  { %v2758_v11 = vpop.f32.mrb[39].mxu1 }
 0x4ad   :  { %v1686_v22 = vpop.f32.mrb[40].mxu1 }
 0x4ae   :  { %2188 = vrot.lane.b32.xlu1 %v1686_v22, %s3153_s7  ;;  %v2782_v15 = vpop.f32.mrb[41].mxu1 }
 0x4cf   :  { %v1169_v46 = vpop.permute.xlu0 %1168 }
 0x4d0   :  { %v1201_v45 = vsel %vm211_vm3, %v3999_v9, %v1169_v46 }
 0x4d2   :  { %v1691_v6 = vpop.f32.mrb[42].mxu1 }
 0x4d3   :  { %2190 = vrot.lane.b32.xlu0 %v1691_v6, %s3153_s7  ;;  %v2785_v39 = vpop.f32.mrb[43].mxu1  ;;  %v1171_v3 = vpop.permute.xlu0 %1170 }
 0x4d6   :  { %v1696_v40 = vpop.f32.mrb[44].mxu1 }
 0x4d7   :  { %v2788_v47 = vpop.f32.mrb[45].mxu1 }
 0x4da   :  { %v1922_v29 = vpop.f32.mrb[46].mxu1 }
 0x4db   :  { %2200 = vrot.lane.b32.xlu1 %v1922_v29, %s3154_s17  ;;  %v2812_v20 = vpop.f32.mrb[47].mxu1 }
 0x4de   :  { %v1927_v13 = vpop.f32.mrb[48].mxu1 }
 0x4df   :  { %2202 = vrot.lane.b32.xlu1 %v1927_v13, %s3154_s17  ;;  %v2815_v28 = vpop.f32.mrb[49].mxu1 }
 0x4e2   :  { %v1932_v42 = vpop.f32.mrb[50].mxu1 }
 0x4e3   :  { %v2818_v56 = vpop.f32.mrb[51].mxu1 }
 0x4e6   :  { %v2158_v59 = vpop.f32.mrb[52].mxu1 }
 0x4e7   :  { %2212 = vrot.lane.b32.xlu1 %v2158_v59, %s3155_s4  ;;  %v2842_v10 = vpop.f32.mrb[53].mxu1 }
 0x4ea   :  { %v2163_v23 = vpop.f32.mrb[54].mxu1 }
 0x4eb   :  { %2192 = vrot.lane.b32.xlu1 %v1696_v40, %s3153_s7  ;;  %2214 = vrot.lane.b32.xlu0 %v2163_v23, %s3155_s4  ;;  %v2845_v61 = vpop.f32.mrb[55].mxu1 }
 0x4ee   :  { %v2168_v57 = vpop.f32.mrb[56].mxu1 }
 0x4ef   :  { %2204 = vrot.lane.b32.xlu0 %v1932_v42, %s3154_s17  ;;  %2216 = vrot.lane.b32.xlu1 %v2168_v57, %s3155_s4  ;;  %v2848_v14 = vpop.f32.mrb[57].mxu1 }
 0x4f8   :  { %v1173_v38 = vpop.permute.xlu0 %1172 }
 0x4f9   :  { %v1203_v8 = vsel %vm211_vm3, %v4003_v2, %v1173_v38  ;;  %v1202_v2 = vsel %vm211_vm3, %v4001_v49, %v1171_v3 }
 0x4fc   :  { %v1181_v35 = vpop.permute.xlu0 %1180 }
 0x4fd   :  { %v1205_v18 = vsel %vm1204_vm8, %v1201_v45, %v1181_v35 }
 0x500   :  { %v1183_v17 = vpop.permute.xlu0 %1182 }
 0x501   :  { %v1206_v21 = vsel %vm1204_vm8, %v1202_v2, %v1183_v17 }
 0x504   :  { %v1185_v34 = vpop.permute.xlu0 %1184 }
 0x505   :  { %v1207_v24 = vsel %vm1204_vm8, %v1203_v8, %v1185_v34 }
 0x508   :  { %v1193_v43 = vpop.permute.xlu0 %1192 }
 0x509   :  { %v1209_v50 = vsel %vm1208_vm9, %v1205_v18, %v1193_v43 }
 0x50a   :  { %2858 = vmatmul.mubr.msk.f32.vlgmr.msra.gmra.mrb[48].mxu0 %vm41_vm1, %v1209_v50 }
 0x50b   :  { %2860 = vmatprep.mubr.msk.f32.mxu0 %vm3139_vm0, %v3140_v4 }
 0x50c   :  { %v1195_v48 = vpop.permute.xlu0 %1194 }
 0x50d   :  { %v1210_v30 = vsel %vm1208_vm9, %v1206_v21, %v1195_v48 }
 0x50e   :  { %2861 = vmatmul.mubr.msk.f32.gmra.mrb[50].mxu0 %vm41_vm1, %v1210_v30 }
 0x50f   :  { %2863 = vmatprep.mubr.msk.f32.mxu0 %vm3139_vm0, %v3140_v4 }
 0x510   :  { %v1197_v9 = vpop.permute.xlu1 %1196 }
 0x511   :  { %v1211_v52 = vsel %vm1208_vm9, %v1207_v24, %v1197_v9 }
 0x520   :  { %v2189_v25 = vpop.permute.xlu1 %2188 }
 0x521   :  { %v2221_v16 = vsel %vm211_vm3, %v1450_v5, %v2189_v25 }
 0x545   :  { %v2191_v49 = vpop.permute.xlu0 %2190 }
 0x546   :  { %v2222_v37 = vsel %vm211_vm3, %v4027_v36, %v2191_v49 }
 0x54d   :  { %v2201_v55 = vpop.permute.xlu1 %2200 }
 0x54e   :  { %v2224_v19 = vsel %vm1204_vm8, %v2221_v16, %v2201_v55 }
 0x551   :  { %v2203_v53 = vpop.permute.xlu1 %2202 }
 0x552   :  { %v2225_v60 = vsel %vm1204_vm8, %v2222_v37, %v2203_v53 }
 0x559   :  { %v2213_v58 = vpop.permute.xlu1 %2212 }
 0x55a   :  { %v2227_v27 = vsel %vm1208_vm9, %v2224_v19, %v2213_v58 }
 0x55b   :  { %v2233_v51 = vrot.slane %v2227_v27, 7 }
 0x55d   :  { %v2193_v31 = vpop.permute.xlu1 %2192  ;;  %v2215_v0 = vpop.permute.xlu0 %2214  ;;  %v2239_v62 = vsel %vm362_vm5, %v1211_v52, %v2233_v51 }
 0x55e   :  { %v2228_v32 = vsel %vm1208_vm9, %v2225_v60, %v2215_v0  ;;  %2864 = vmatmul.mubr.msk.f32.gmra.mrb[52].mxu0 %vm41_vm1, %v2239_v62  ;;  %v2223_v63 = vsel %vm211_vm3, %v4029_v1, %v2193_v31 }
 0x55f   :  { %v2234_v33 = vrot.slane %v2228_v32, 7  ;;  %2866 = vmatprep.mubr.msk.f32.mxu0 %vm3139_vm0, %v3140_v4 }
 0x561   :  { %v2205_v44 = vpop.permute.xlu0 %2204  ;;  %v2217_v12 = vpop.permute.xlu1 %2216  ;;  %v2235_v54 = vsel %vm362_vm5, %v2233_v51, %v2234_v33 }
 0x562   :  { %v2226_v26 = vsel %vm1204_vm8, %v2223_v63, %v2205_v44  ;;  %2867 = vmatmul.mubr.msk.f32.gmra.mrb[54].mxu0 %vm41_vm1, %v2235_v54 }
 0x563   :  { %v2229_v5 = vsel %vm1208_vm9, %v2226_v26, %v2217_v12  ;;  %2869 = vmatprep.mubr.msk.f32.mxu0 %vm3139_vm0, %v3140_v4 }
 0x564   :  { %v2236_v7 = vrot.slane %v2229_v5, 7 }
 0x566   :  { %v2237_v36 = vsel %vm362_vm5, %v2234_v33, %v2236_v7 }
 0x567   :  { %2870 = vmatmul.mubr.msk.f32.gmra.mrb[56].mxu0 %vm41_vm1, %v2237_v36 }
 0x5dd   :  { %v2330_v1 = vpop.f32.mrb[48].mxu0 }
 0x5de   :  { %v2331_v11 = vadd.f32 %v2466_v41, %v2330_v1  ;;  %v2859_v22 = vpop.f32.mrb[49].mxu0 }
 0x5e0   :  { %2354 = vst.msk [vmem:[%s4108_s6] sm:$0xff] %vm41_vm1, %v2331_v11 }
 0x5e1   :  { %v2335_v15 = vpop.f32.mrb[50].mxu0 }
 0x5e2   :  { %v2336_v6 = vadd.f32 %v2466_v41, %v2335_v15  ;;  %v2862_v4 = vpop.f32.mrb[51].mxu0 }
 0x5e4   :  { %2355 = vst.msk [vmem:[%s4108_s6 + $0x8] sm:$0xff] %vm41_vm1, %v2336_v6 }
 0x631   :  { %v2340_v39 = vpop.f32.mrb[52].mxu0 }
 0x632   :  { %v2341_v40 = vadd.f32 %v2466_v41, %v2340_v39  ;;  %v2865_v47 = vpop.f32.mrb[53].mxu0 }
 0x634   :  { %2356 = vst.msk [vmem:[%s4108_s6 + $0x10] sm:$0xff] %vm41_vm1, %v2341_v40 }
 0x635   :  { %v2345_v29 = vpop.f32.mrb[54].mxu0 }
 0x636   :  { %v2346_v20 = vadd.f32 %v2466_v41, %v2345_v29  ;;  %v2868_v13 = vpop.f32.mrb[55].mxu0 }
 0x638   :  { %2357 = vst.msk [vmem:[%s4108_s6 + $0x18] sm:$0xff] %vm41_vm1, %v2346_v20 }
 0x63a   :  { %v2350_v28 = vpop.f32.mrb[56].mxu0 }
 0x63b   :  { %v2351_v42 = vadd.f32 %v2466_v41, %v2350_v28  ;;  %v2871_v56 = vpop.f32.mrb[57].mxu0 }
 0x63d   :  { %2359 = vst.msk [vmem:[%s4108_s6 + $0x20] sm:$0x3] %vm2358_vm10, %v2351_v42 }

</bundles_post_ra>
